<compile_context>
chip_gen: v5e
topology: v5e:2x2
jax: 0.10.0
libtpu: 0.0.40
codegen_flags: <defaults>
</compile_context>

<pallas_src>
import functools

import jax
import jax.numpy as jnp
from jax import lax
from jax.experimental import pallas as pl
from jax.experimental.pallas import tpu as pltpu


def _lstm_recurrent_kernel(xw_ref, whh_ref, out_ref, h_out_ref, c_out_ref,
                           h_sc, c_sc, *, hidden_size, block_t):
    """Recurrent part only.  xw_ref holds x@W_ih^T + (b_ih+b_hh) precomputed.

    xw_ref:  (Bc, Tc, 4H)   whh_ref: (H, 4H)
    out_ref: (Bc, Tc, H)    h_out_ref/c_out_ref: (Bc, H)
    h_sc/c_sc: (Bc, H) VMEM scratch carrying state across the time grid axis.
    """
    tb = pl.program_id(1)           # time-block index (sequential axis)

    @pl.when(tb == 0)
    def _():
        h_sc[...] = jnp.zeros_like(h_sc)
        c_sc[...] = jnp.zeros_like(c_sc)

    H = hidden_size
    whh = whh_ref[...]              # (H, 4H), loaded once (grid-invariant block)

    def step(k, carry):
        h_prev, c_prev = carry
        xw_t = xw_ref[:, k, :]      # (Bc, 4H): precomputed input projection + bias
        gates = xw_t + jnp.dot(h_prev, whh, preferred_element_type=jnp.float32)

        i_g = jax.nn.sigmoid(gates[:, 0 * H:1 * H])
        f_g = jax.nn.sigmoid(gates[:, 1 * H:2 * H])
        g_g = jnp.tanh(gates[:, 2 * H:3 * H])
        o_g = jax.nn.sigmoid(gates[:, 3 * H:4 * H])

        c_new = f_g * c_prev + i_g * g_g
        h_new = o_g * jnp.tanh(c_new)

        out_ref[:, k, :] = h_new.astype(out_ref.dtype)
        return h_new, c_new

    h, c = lax.fori_loop(0, block_t, step, (h_sc[...], c_sc[...]), unroll=True)
    h_sc[...] = h
    c_sc[...] = c

    @pl.when(tb == pl.num_programs(1) - 1)
    def _():
        h_out_ref[...] = h.astype(h_out_ref.dtype)
        c_out_ref[...] = c.astype(c_out_ref.dtype)


def _pick_block(n, max_block):
    """Largest divisor of n that is <= max_block."""
    for cand in range(min(n, max_block), 0, -1):
        if n % cand == 0:
            return cand
    return 1


def encoder_lstm_forward(x, w_ih, w_hh, b_ih, b_hh, *, max_time_block=32):
    """x: (B, T, D) float.  Weights in PyTorch layout:
       w_ih: (4H, D), w_hh: (4H, H), b_ih/b_hh: (4H,).
       Returns (output (B, T, H), (h (B, H), c (B, H)))."""
    B, T, D = x.shape
    H = w_hh.shape[1]
    x = x.astype(jnp.float32)

    wih_t = jnp.transpose(w_ih).astype(jnp.float32)      # (D, 4H)
    whh_t = jnp.transpose(w_hh).astype(jnp.float32)      # (H, 4H)
    bias = (b_ih + b_hh).astype(jnp.float32)             # (4H,)

    # Hoisted, non-recurrent input projection: one big batch-first matmul.
    xw = jnp.einsum("btd,dg->btg", x, wih_t,
                    precision=lax.Precision.HIGHEST,
                    preferred_element_type=jnp.float32) + bias   # (B, T, 4H)

    # Time blocking (amortize per-grid-step overhead); batch blocking only
    # when the batch is big enough to be worth sharding across cores (v7x).
    Tc = _pick_block(T, max_time_block)
    Bc = _pick_block(B, max(1, B // 2)) if B >= 16 else B
    nb, nt = B // Bc, T // Tc

    kernel = functools.partial(_lstm_recurrent_kernel,
                               hidden_size=H, block_t=Tc)

    # Rough VMEM budget (bytes) with headroom, clamped for v7x's smaller VMEM.
    vmem_bytes = 4 * (2 * Bc * Tc * 4 * H        # xw blocks (double-buffered)
                      + 2 * H * 4 * H            # W_hh^T
                      + 2 * Bc * Tc * H          # output blocks
                      + 2 * 2 * Bc * H           # final h/c blocks
                      + 2 * Bc * H)              # h/c scratch
    vmem_limit = int(min(max(2 * vmem_bytes, 8 * 1024 * 1024),
                         48 * 1024 * 1024))

    out, h_last, c_last = pl.pallas_call(
        kernel,
        out_shape=(
            jax.ShapeDtypeStruct((B, T, H), jnp.float32),
            jax.ShapeDtypeStruct((B, H), jnp.float32),
            jax.ShapeDtypeStruct((B, H), jnp.float32),
        ),
        grid_spec=pltpu.PrefetchScalarGridSpec(
            num_scalar_prefetch=0,
            grid=(nb, nt),
            in_specs=[
                # precomputed input projection, batch-first (no transposes)
                pl.BlockSpec((Bc, Tc, 4 * H), lambda b, t: (b, t, 0)),
                # recurrent weight, grid-invariant block index -> DMA'd once
                pl.BlockSpec((H, 4 * H), lambda b, t: (0, 0)),
            ],
            out_specs=[
                pl.BlockSpec((Bc, Tc, H), lambda b, t: (b, t, 0)),
                pl.BlockSpec((Bc, H), lambda b, t: (b, 0)),
                pl.BlockSpec((Bc, H), lambda b, t: (b, 0)),
            ],
            scratch_shapes=[
                pltpu.VMEM((Bc, H), jnp.float32),    # h state
                pltpu.VMEM((Bc, H), jnp.float32),    # c state
            ],
        ),
        compiler_params=pltpu.CompilerParams(
            dimension_semantics=("parallel", "arbitrary"),   # time is sequential
            vmem_limit_bytes=vmem_limit,
        ),
    )(xw, whh_t)

    return out, (h_last, c_last)


def _reference_lstm(x, w_ih, w_hh, b_ih, b_hh):
    """Pure-JAX reference replicating PyTorch nn.LSTM (single layer)."""
    B, T, D = x.shape
    H = w_hh.shape[1]

    def step(carry, x_t):
        h, c = carry
        gates = x_t @ w_ih.T + b_ih + h @ w_hh.T + b_hh
        i = jax.nn.sigmoid(gates[:, 0 * H:1 * H])
        f = jax.nn.sigmoid(gates[:, 1 * H:2 * H])
        g = jnp.tanh(gates[:, 2 * H:3 * H])
        o = jax.nn.sigmoid(gates[:, 3 * H:4 * H])
        c_new = f * c + i * g
        h_new = o * jnp.tanh(c_new)
        return (h_new, c_new), h_new

    init = (jnp.zeros((B, H), jnp.float32), jnp.zeros((B, H), jnp.float32))
    (h, c), out = lax.scan(step, init, jnp.transpose(x, (1, 0, 2)))
    return jnp.transpose(out, (1, 0, 2)), (h, c)


if __name__ == "__main__":
    # Small shapes: univariate-ish seq2seq encoder.
    batch, seq_len, input_size, hidden_size = 2, 8, 4, 32

    key = jax.random.PRNGKey(0)
    kx, k1, k2, k3, k4 = jax.random.split(key, 5)

    # PyTorch default init: U(-1/sqrt(H), 1/sqrt(H))
    bound = 1.0 / (hidden_size ** 0.5)
    w_ih = jax.random.uniform(k1, (4 * hidden_size, input_size),
                              jnp.float32, -bound, bound)
    w_hh = jax.random.uniform(k2, (4 * hidden_size, hidden_size),
                              jnp.float32, -bound, bound)
    b_ih = jax.random.uniform(k3, (4 * hidden_size,), jnp.float32, -bound, bound)
    b_hh = jax.random.uniform(k4, (4 * hidden_size,), jnp.float32, -bound, bound)

    x = jax.random.normal(kx, (batch, seq_len, input_size), jnp.float32)

    output, (h, c) = encoder_lstm_forward(x, w_ih, w_hh, b_ih, b_hh)
    jax.block_until_ready((output, h, c))

    ref_out, (ref_h, ref_c) = _reference_lstm(x, w_ih, w_hh, b_ih, b_hh)
    assert output.shape == (batch, seq_len, hidden_size)
    assert h.shape == (batch, hidden_size) and c.shape == (batch, hidden_size)
    assert jnp.allclose(output, ref_out, atol=1e-5, rtol=1e-5)
    assert jnp.allclose(h, ref_h, atol=1e-5, rtol=1e-5)
    assert jnp.allclose(c, ref_c, atol=1e-5, rtol=1e-5)

    print("KERNEL_OK")
</pallas_src>

<mosaic_0001>
module attributes {stable_mosaic.version = 11 : i64} {
  func.func @_lstm_recurrent_kernel(%arg0: i32, %arg1: i32, %arg2: memref<2x8x128xf32, #tpu.memory_space<vmem>>, %arg3: memref<32x128xf32, #tpu.memory_space<vmem>>, %arg4: memref<2x8x32xf32, #tpu.memory_space<vmem>>, %arg5: memref<2x32xf32, #tpu.memory_space<vmem>>, %arg6: memref<2x32xf32, #tpu.memory_space<vmem>>, %arg7: memref<2x32xf32, #tpu.memory_space<vmem>>, %arg8: memref<2x32xf32, #tpu.memory_space<vmem>>) attributes {dimension_semantics = [#tpu.dimension_semantics<parallel>, #tpu.dimension_semantics<arbitrary>], iteration_bounds = array<i64: 1, 1>, scalar_prefetch = 0 : i64, scratch_operands = 2 : i64, tpu.core_type = #tpu.core_type<tc>, window_params = [{transform_indices = @transform_0, window_bounds = array<i64: 2, 8, 128>}, {pipeline_mode = #tpu.pipeline_mode<synchronous>, transform_indices = @transform_1, window_bounds = array<i64: 32, 128>}, {transform_indices = @transform_2, window_bounds = array<i64: 2, 8, 32>}, {transform_indices = @transform_3, window_bounds = array<i64: 2, 32>}, {transform_indices = @transform_4, window_bounds = array<i64: 2, 32>}]} {
    %c0_i32 = arith.constant 0 : i32
    %0 = arith.cmpi eq, %arg1, %c0_i32 : i32
    %1 = arith.extui %0 : i1 to i32
    %c0_i32_0 = arith.constant 0 : i32
    %2 = arith.cmpi ne, %1, %c0_i32_0 : i32
    scf.if %2 {
      %cst_76 = arith.constant 0.000000e+00 : f32
      %283 = vector.broadcast %cst_76 : f32 to vector<2x32xf32>
      %c0_77 = arith.constant 0 : index
      %c0_78 = arith.constant 0 : index
      %284 = vector.load %arg7[%c0_77, %c0_78] : memref<2x32xf32, #tpu.memory_space<vmem>>, vector<2x32xf32>
      tpu.vector_store %arg7[%c0_77, %c0_78], %283 {strides = array<i32>} : memref<2x32xf32, #tpu.memory_space<vmem>>, vector<2x32xf32>,
      %cst_79 = arith.constant 0.000000e+00 : f32
      %285 = vector.broadcast %cst_79 : f32 to vector<2x32xf32>
      %c0_80 = arith.constant 0 : index
      %c0_81 = arith.constant 0 : index
      %286 = vector.load %arg8[%c0_80, %c0_81] : memref<2x32xf32, #tpu.memory_space<vmem>>, vector<2x32xf32>
      tpu.vector_store %arg8[%c0_80, %c0_81], %285 {strides = array<i32>} : memref<2x32xf32, #tpu.memory_space<vmem>>, vector<2x32xf32>,
    } else {
    }
    %c0 = arith.constant 0 : index
    %c0_1 = arith.constant 0 : index
    %3 = vector.load %arg3[%c0, %c0_1] : memref<32x128xf32, #tpu.memory_space<vmem>>, vector<32x128xf32>
    %c0_2 = arith.constant 0 : index
    %c0_3 = arith.constant 0 : index
    %4 = vector.load %arg7[%c0_2, %c0_3] : memref<2x32xf32, #tpu.memory_space<vmem>>, vector<2x32xf32>
    %c0_4 = arith.constant 0 : index
    %c0_5 = arith.constant 0 : index
    %5 = vector.load %arg8[%c0_4, %c0_5] : memref<2x32xf32, #tpu.memory_space<vmem>>, vector<2x32xf32>
    %c0_i32_6 = arith.constant 0 : i32
    %c0_7 = arith.constant 0 : index
    %6 = arith.index_cast %c0_i32_6 : i32 to index
    %c0_8 = arith.constant 0 : index
    %7 = vector.load %arg2[%c0_7, %6, %c0_8] : memref<2x8x128xf32, #tpu.memory_space<vmem>>, vector<2x1x128xf32>
    %8 = vector.shape_cast %7 : vector<2x1x128xf32> to vector<2x128xf32>
    %cst = arith.constant dense<0.000000e+00> : vector<2x128xf32>
    %9 = tpu.matmul %4, %3, %cst {dimension_numbers = #tpu.dot_dimension_numbers<[1], [0], [0], [1], [0, 0, 1, 1], [], []>} : vector<2x32xf32>, vector<32x128xf32>, vector<2x128xf32> -> vector<2x128xf32>
    %10 = arith.addf %8, %9 : vector<2x128xf32>
    %11 = vector.extract_strided_slice %10 {offsets = [0, 0], sizes = [2, 32], strides = [1, 1]} : vector<2x128xf32> to vector<2x32xf32>
    %12 = arith.negf %11 : vector<2x32xf32>
    %13 = math.exp %12 : vector<2x32xf32>
    %cst_9 = arith.constant 1.000000e+00 : f32
    %14 = vector.broadcast %cst_9 : f32 to vector<2x32xf32>
    %15 = arith.addf %14, %13 : vector<2x32xf32>
    %16 = arith.divf %14, %15 : vector<2x32xf32>
    %17 = vector.extract_strided_slice %10 {offsets = [0, 32], sizes = [2, 32], strides = [1, 1]} : vector<2x128xf32> to vector<2x32xf32>
    %18 = arith.negf %17 : vector<2x32xf32>
    %19 = math.exp %18 : vector<2x32xf32>
    %cst_10 = arith.constant 1.000000e+00 : f32
    %20 = vector.broadcast %cst_10 : f32 to vector<2x32xf32>
    %21 = arith.addf %20, %19 : vector<2x32xf32>
    %22 = arith.divf %20, %21 : vector<2x32xf32>
    %23 = vector.extract_strided_slice %10 {offsets = [0, 64], sizes = [2, 32], strides = [1, 1]} : vector<2x128xf32> to vector<2x32xf32>
    %24 = math.tanh %23 : vector<2x32xf32>
    %25 = vector.extract_strided_slice %10 {offsets = [0, 96], sizes = [2, 32], strides = [1, 1]} : vector<2x128xf32> to vector<2x32xf32>
    %26 = arith.negf %25 : vector<2x32xf32>
    %27 = math.exp %26 : vector<2x32xf32>
    %cst_11 = arith.constant 1.000000e+00 : f32
    %28 = vector.broadcast %cst_11 : f32 to vector<2x32xf32>
    %29 = arith.addf %28, %27 : vector<2x32xf32>
    %30 = arith.divf %28, %29 : vector<2x32xf32>
    %31 = arith.mulf %22, %5 : vector<2x32xf32>
    %32 = arith.mulf %16, %24 : vector<2x32xf32>
    %33 = arith.addf %31, %32 : vector<2x32xf32>
    %34 = math.tanh %33 : vector<2x32xf32>
    %35 = arith.mulf %30, %34 : vector<2x32xf32>
    %c0_12 = arith.constant 0 : index
    %36 = arith.index_cast %c0_i32_6 : i32 to index
    %c0_13 = arith.constant 0 : index
    %37 = vector.load %arg4[%c0_12, %36, %c0_13] : memref<2x8x32xf32, #tpu.memory_space<vmem>>, vector<2x1x32xf32>
    %38 = vector.shape_cast %37 : vector<2x1x32xf32> to vector<2x32xf32>
    %39 = vector.shape_cast %35 : vector<2x32xf32> to vector<2x1x32xf32>
    tpu.vector_store %arg4[%c0_12, %36, %c0_13], %39 {strides = array<i32>} : memref<2x8x32xf32, #tpu.memory_space<vmem>>, vector<2x1x32xf32>,
    %c1_i32 = arith.constant 1 : i32
    %c0_14 = arith.constant 0 : index
    %40 = arith.index_cast %c1_i32 : i32 to index
    %c0_15 = arith.constant 0 : index
    %41 = vector.load %arg2[%c0_14, %40, %c0_15] : memref<2x8x128xf32, #tpu.memory_space<vmem>>, vector<2x1x128xf32>
    %42 = vector.shape_cast %41 : vector<2x1x128xf32> to vector<2x128xf32>
    %cst_16 = arith.constant dense<0.000000e+00> : vector<2x128xf32>
    %43 = tpu.matmul %35, %3, %cst_16 {dimension_numbers = #tpu.dot_dimension_numbers<[1], [0], [0], [1], [0, 0, 1, 1], [], []>} : vector<2x32xf32>, vector<32x128xf32>, vector<2x128xf32> -> vector<2x128xf32>
    %44 = arith.addf %42, %43 : vector<2x128xf32>
    %45 = vector.extract_strided_slice %44 {offsets = [0, 0], sizes = [2, 32], strides = [1, 1]} : vector<2x128xf32> to vector<2x32xf32>
    %46 = arith.negf %45 : vector<2x32xf32>
    %47 = math.exp %46 : vector<2x32xf32>
    %cst_17 = arith.constant 1.000000e+00 : f32
    %48 = vector.broadcast %cst_17 : f32 to vector<2x32xf32>
    %49 = arith.addf %48, %47 : vector<2x32xf32>
    %50 = arith.divf %48, %49 : vector<2x32xf32>
    %51 = vector.extract_strided_slice %44 {offsets = [0, 32], sizes = [2, 32], strides = [1, 1]} : vector<2x128xf32> to vector<2x32xf32>
    %52 = arith.negf %51 : vector<2x32xf32>
    %53 = math.exp %52 : vector<2x32xf32>
    %cst_18 = arith.constant 1.000000e+00 : f32
    %54 = vector.broadcast %cst_18 : f32 to vector<2x32xf32>
    %55 = arith.addf %54, %53 : vector<2x32xf32>
    %56 = arith.divf %54, %55 : vector<2x32xf32>
    %57 = vector.extract_strided_slice %44 {offsets = [0, 64], sizes = [2, 32], strides = [1, 1]} : vector<2x128xf32> to vector<2x32xf32>
    %58 = math.tanh %57 : vector<2x32xf32>
    %59 = vector.extract_strided_slice %44 {offsets = [0, 96], sizes = [2, 32], strides = [1, 1]} : vector<2x128xf32> to vector<2x32xf32>
    %60 = arith.negf %59 : vector<2x32xf32>
    %61 = math.exp %60 : vector<2x32xf32>
    %cst_19 = arith.constant 1.000000e+00 : f32
    %62 = vector.broadcast %cst_19 : f32 to vector<2x32xf32>
    %63 = arith.addf %62, %61 : vector<2x32xf32>
    %64 = arith.divf %62, %63 : vector<2x32xf32>
    %65 = arith.mulf %56, %33 : vector<2x32xf32>
    %66 = arith.mulf %50, %58 : vector<2x32xf32>
    %67 = arith.addf %65, %66 : vector<2x32xf32>
    %68 = math.tanh %67 : vector<2x32xf32>
    %69 = arith.mulf %64, %68 : vector<2x32xf32>
    %c0_20 = arith.constant 0 : index
    %70 = arith.index_cast %c1_i32 : i32 to index
    %c0_21 = arith.constant 0 : index
    %71 = vector.load %arg4[%c0_20, %70, %c0_21] : memref<2x8x32xf32, #tpu.memory_space<vmem>>, vector<2x1x32xf32>
    %72 = vector.shape_cast %71 : vector<2x1x32xf32> to vector<2x32xf32>
    %73 = vector.shape_cast %69 : vector<2x32xf32> to vector<2x1x32xf32>
    tpu.vector_store %arg4[%c0_20, %70, %c0_21], %73 {strides = array<i32>} : memref<2x8x32xf32, #tpu.memory_space<vmem>>, vector<2x1x32xf32>,
    %c2_i32 = arith.constant 2 : i32
    %c0_22 = arith.constant 0 : index
    %74 = arith.index_cast %c2_i32 : i32 to index
    %c0_23 = arith.constant 0 : index
    %75 = vector.load %arg2[%c0_22, %74, %c0_23] : memref<2x8x128xf32, #tpu.memory_space<vmem>>, vector<2x1x128xf32>
    %76 = vector.shape_cast %75 : vector<2x1x128xf32> to vector<2x128xf32>
    %cst_24 = arith.constant dense<0.000000e+00> : vector<2x128xf32>
    %77 = tpu.matmul %69, %3, %cst_24 {dimension_numbers = #tpu.dot_dimension_numbers<[1], [0], [0], [1], [0, 0, 1, 1], [], []>} : vector<2x32xf32>, vector<32x128xf32>, vector<2x128xf32> -> vector<2x128xf32>
    %78 = arith.addf %76, %77 : vector<2x128xf32>
    %79 = vector.extract_strided_slice %78 {offsets = [0, 0], sizes = [2, 32], strides = [1, 1]} : vector<2x128xf32> to vector<2x32xf32>
    %80 = arith.negf %79 : vector<2x32xf32>
    %81 = math.exp %80 : vector<2x32xf32>
    %cst_25 = arith.constant 1.000000e+00 : f32
    %82 = vector.broadcast %cst_25 : f32 to vector<2x32xf32>
    %83 = arith.addf %82, %81 : vector<2x32xf32>
    %84 = arith.divf %82, %83 : vector<2x32xf32>
    %85 = vector.extract_strided_slice %78 {offsets = [0, 32], sizes = [2, 32], strides = [1, 1]} : vector<2x128xf32> to vector<2x32xf32>
    %86 = arith.negf %85 : vector<2x32xf32>
    %87 = math.exp %86 : vector<2x32xf32>
    %cst_26 = arith.constant 1.000000e+00 : f32
    %88 = vector.broadcast %cst_26 : f32 to vector<2x32xf32>
    %89 = arith.addf %88, %87 : vector<2x32xf32>
    %90 = arith.divf %88, %89 : vector<2x32xf32>
    %91 = vector.extract_strided_slice %78 {offsets = [0, 64], sizes = [2, 32], strides = [1, 1]} : vector<2x128xf32> to vector<2x32xf32>
    %92 = math.tanh %91 : vector<2x32xf32>
    %93 = vector.extract_strided_slice %78 {offsets = [0, 96], sizes = [2, 32], strides = [1, 1]} : vector<2x128xf32> to vector<2x32xf32>
    %94 = arith.negf %93 : vector<2x32xf32>
    %95 = math.exp %94 : vector<2x32xf32>
    %cst_27 = arith.constant 1.000000e+00 : f32
    %96 = vector.broadcast %cst_27 : f32 to vector<2x32xf32>
    %97 = arith.addf %96, %95 : vector<2x32xf32>
    %98 = arith.divf %96, %97 : vector<2x32xf32>
    %99 = arith.mulf %90, %67 : vector<2x32xf32>
    %100 = arith.mulf %84, %92 : vector<2x32xf32>
    %101 = arith.addf %99, %100 : vector<2x32xf32>
    %102 = math.tanh %101 : vector<2x32xf32>
    %103 = arith.mulf %98, %102 : vector<2x32xf32>
    %c0_28 = arith.constant 0 : index
    %104 = arith.index_cast %c2_i32 : i32 to index
    %c0_29 = arith.constant 0 : index
    %105 = vector.load %arg4[%c0_28, %104, %c0_29] : memref<2x8x32xf32, #tpu.memory_space<vmem>>, vector<2x1x32xf32>
    %106 = vector.shape_cast %105 : vector<2x1x32xf32> to vector<2x32xf32>
    %107 = vector.shape_cast %103 : vector<2x32xf32> to vector<2x1x32xf32>
    tpu.vector_store %arg4[%c0_28, %104, %c0_29], %107 {strides = array<i32>} : memref<2x8x32xf32, #tpu.memory_space<vmem>>, vector<2x1x32xf32>,
    %c3_i32 = arith.constant 3 : i32
    %c0_30 = arith.constant 0 : index
    %108 = arith.index_cast %c3_i32 : i32 to index
    %c0_31 = arith.constant 0 : index
    %109 = vector.load %arg2[%c0_30, %108, %c0_31] : memref<2x8x128xf32, #tpu.memory_space<vmem>>, vector<2x1x128xf32>
    %110 = vector.shape_cast %109 : vector<2x1x128xf32> to vector<2x128xf32>
    %cst_32 = arith.constant dense<0.000000e+00> : vector<2x128xf32>
    %111 = tpu.matmul %103, %3, %cst_32 {dimension_numbers = #tpu.dot_dimension_numbers<[1], [0], [0], [1], [0, 0, 1, 1], [], []>} : vector<2x32xf32>, vector<32x128xf32>, vector<2x128xf32> -> vector<2x128xf32>
    %112 = arith.addf %110, %111 : vector<2x128xf32>
    %113 = vector.extract_strided_slice %112 {offsets = [0, 0], sizes = [2, 32], strides = [1, 1]} : vector<2x128xf32> to vector<2x32xf32>
    %114 = arith.negf %113 : vector<2x32xf32>
    %115 = math.exp %114 : vector<2x32xf32>
    %cst_33 = arith.constant 1.000000e+00 : f32
    %116 = vector.broadcast %cst_33 : f32 to vector<2x32xf32>
    %117 = arith.addf %116, %115 : vector<2x32xf32>
    %118 = arith.divf %116, %117 : vector<2x32xf32>
    %119 = vector.extract_strided_slice %112 {offsets = [0, 32], sizes = [2, 32], strides = [1, 1]} : vector<2x128xf32> to vector<2x32xf32>
    %120 = arith.negf %119 : vector<2x32xf32>
    %121 = math.exp %120 : vector<2x32xf32>
    %cst_34 = arith.constant 1.000000e+00 : f32
    %122 = vector.broadcast %cst_34 : f32 to vector<2x32xf32>
    %123 = arith.addf %122, %121 : vector<2x32xf32>
    %124 = arith.divf %122, %123 : vector<2x32xf32>
    %125 = vector.extract_strided_slice %112 {offsets = [0, 64], sizes = [2, 32], strides = [1, 1]} : vector<2x128xf32> to vector<2x32xf32>
    %126 = math.tanh %125 : vector<2x32xf32>
    %127 = vector.extract_strided_slice %112 {offsets = [0, 96], sizes = [2, 32], strides = [1, 1]} : vector<2x128xf32> to vector<2x32xf32>
    %128 = arith.negf %127 : vector<2x32xf32>
    %129 = math.exp %128 : vector<2x32xf32>
    %cst_35 = arith.constant 1.000000e+00 : f32
    %130 = vector.broadcast %cst_35 : f32 to vector<2x32xf32>
    %131 = arith.addf %130, %129 : vector<2x32xf32>
    %132 = arith.divf %130, %131 : vector<2x32xf32>
    %133 = arith.mulf %124, %101 : vector<2x32xf32>
    %134 = arith.mulf %118, %126 : vector<2x32xf32>
    %135 = arith.addf %133, %134 : vector<2x32xf32>
    %136 = math.tanh %135 : vector<2x32xf32>
    %137 = arith.mulf %132, %136 : vector<2x32xf32>
    %c0_36 = arith.constant 0 : index
    %138 = arith.index_cast %c3_i32 : i32 to index
    %c0_37 = arith.constant 0 : index
    %139 = vector.load %arg4[%c0_36, %138, %c0_37] : memref<2x8x32xf32, #tpu.memory_space<vmem>>, vector<2x1x32xf32>
    %140 = vector.shape_cast %139 : vector<2x1x32xf32> to vector<2x32xf32>
    %141 = vector.shape_cast %137 : vector<2x32xf32> to vector<2x1x32xf32>
    tpu.vector_store %arg4[%c0_36, %138, %c0_37], %141 {strides = array<i32>} : memref<2x8x32xf32, #tpu.memory_space<vmem>>, vector<2x1x32xf32>,
    %c4_i32 = arith.constant 4 : i32
    %c0_38 = arith.constant 0 : index
    %142 = arith.index_cast %c4_i32 : i32 to index
    %c0_39 = arith.constant 0 : index
    %143 = vector.load %arg2[%c0_38, %142, %c0_39] : memref<2x8x128xf32, #tpu.memory_space<vmem>>, vector<2x1x128xf32>
    %144 = vector.shape_cast %143 : vector<2x1x128xf32> to vector<2x128xf32>
    %cst_40 = arith.constant dense<0.000000e+00> : vector<2x128xf32>
    %145 = tpu.matmul %137, %3, %cst_40 {dimension_numbers = #tpu.dot_dimension_numbers<[1], [0], [0], [1], [0, 0, 1, 1], [], []>} : vector<2x32xf32>, vector<32x128xf32>, vector<2x128xf32> -> vector<2x128xf32>
    %146 = arith.addf %144, %145 : vector<2x128xf32>
    %147 = vector.extract_strided_slice %146 {offsets = [0, 0], sizes = [2, 32], strides = [1, 1]} : vector<2x128xf32> to vector<2x32xf32>
    %148 = arith.negf %147 : vector<2x32xf32>
    %149 = math.exp %148 : vector<2x32xf32>
    %cst_41 = arith.constant 1.000000e+00 : f32
    %150 = vector.broadcast %cst_41 : f32 to vector<2x32xf32>
    %151 = arith.addf %150, %149 : vector<2x32xf32>
    %152 = arith.divf %150, %151 : vector<2x32xf32>
    %153 = vector.extract_strided_slice %146 {offsets = [0, 32], sizes = [2, 32], strides = [1, 1]} : vector<2x128xf32> to vector<2x32xf32>
    %154 = arith.negf %153 : vector<2x32xf32>
    %155 = math.exp %154 : vector<2x32xf32>
    %cst_42 = arith.constant 1.000000e+00 : f32
    %156 = vector.broadcast %cst_42 : f32 to vector<2x32xf32>
    %157 = arith.addf %156, %155 : vector<2x32xf32>
    %158 = arith.divf %156, %157 : vector<2x32xf32>
    %159 = vector.extract_strided_slice %146 {offsets = [0, 64], sizes = [2, 32], strides = [1, 1]} : vector<2x128xf32> to vector<2x32xf32>
    %160 = math.tanh %159 : vector<2x32xf32>
    %161 = vector.extract_strided_slice %146 {offsets = [0, 96], sizes = [2, 32], strides = [1, 1]} : vector<2x128xf32> to vector<2x32xf32>
    %162 = arith.negf %161 : vector<2x32xf32>
    %163 = math.exp %162 : vector<2x32xf32>
    %cst_43 = arith.constant 1.000000e+00 : f32
    %164 = vector.broadcast %cst_43 : f32 to vector<2x32xf32>
    %165 = arith.addf %164, %163 : vector<2x32xf32>
    %166 = arith.divf %164, %165 : vector<2x32xf32>
    %167 = arith.mulf %158, %135 : vector<2x32xf32>
    %168 = arith.mulf %152, %160 : vector<2x32xf32>
    %169 = arith.addf %167, %168 : vector<2x32xf32>
    %170 = math.tanh %169 : vector<2x32xf32>
    %171 = arith.mulf %166, %170 : vector<2x32xf32>
    %c0_44 = arith.constant 0 : index
    %172 = arith.index_cast %c4_i32 : i32 to index
    %c0_45 = arith.constant 0 : index
    %173 = vector.load %arg4[%c0_44, %172, %c0_45] : memref<2x8x32xf32, #tpu.memory_space<vmem>>, vector<2x1x32xf32>
    %174 = vector.shape_cast %173 : vector<2x1x32xf32> to vector<2x32xf32>
    %175 = vector.shape_cast %171 : vector<2x32xf32> to vector<2x1x32xf32>
    tpu.vector_store %arg4[%c0_44, %172, %c0_45], %175 {strides = array<i32>} : memref<2x8x32xf32, #tpu.memory_space<vmem>>, vector<2x1x32xf32>,
    %c5_i32 = arith.constant 5 : i32
    %c0_46 = arith.constant 0 : index
    %176 = arith.index_cast %c5_i32 : i32 to index
    %c0_47 = arith.constant 0 : index
    %177 = vector.load %arg2[%c0_46, %176, %c0_47] : memref<2x8x128xf32, #tpu.memory_space<vmem>>, vector<2x1x128xf32>
    %178 = vector.shape_cast %177 : vector<2x1x128xf32> to vector<2x128xf32>
    %cst_48 = arith.constant dense<0.000000e+00> : vector<2x128xf32>
    %179 = tpu.matmul %171, %3, %cst_48 {dimension_numbers = #tpu.dot_dimension_numbers<[1], [0], [0], [1], [0, 0, 1, 1], [], []>} : vector<2x32xf32>, vector<32x128xf32>, vector<2x128xf32> -> vector<2x128xf32>
    %180 = arith.addf %178, %179 : vector<2x128xf32>
    %181 = vector.extract_strided_slice %180 {offsets = [0, 0], sizes = [2, 32], strides = [1, 1]} : vector<2x128xf32> to vector<2x32xf32>
    %182 = arith.negf %181 : vector<2x32xf32>
    %183 = math.exp %182 : vector<2x32xf32>
    %cst_49 = arith.constant 1.000000e+00 : f32
    %184 = vector.broadcast %cst_49 : f32 to vector<2x32xf32>
    %185 = arith.addf %184, %183 : vector<2x32xf32>
    %186 = arith.divf %184, %185 : vector<2x32xf32>
    %187 = vector.extract_strided_slice %180 {offsets = [0, 32], sizes = [2, 32], strides = [1, 1]} : vector<2x128xf32> to vector<2x32xf32>
    %188 = arith.negf %187 : vector<2x32xf32>
    %189 = math.exp %188 : vector<2x32xf32>
    %cst_50 = arith.constant 1.000000e+00 : f32
    %190 = vector.broadcast %cst_50 : f32 to vector<2x32xf32>
    %191 = arith.addf %190, %189 : vector<2x32xf32>
    %192 = arith.divf %190, %191 : vector<2x32xf32>
    %193 = vector.extract_strided_slice %180 {offsets = [0, 64], sizes = [2, 32], strides = [1, 1]} : vector<2x128xf32> to vector<2x32xf32>
    %194 = math.tanh %193 : vector<2x32xf32>
    %195 = vector.extract_strided_slice %180 {offsets = [0, 96], sizes = [2, 32], strides = [1, 1]} : vector<2x128xf32> to vector<2x32xf32>
    %196 = arith.negf %195 : vector<2x32xf32>
    %197 = math.exp %196 : vector<2x32xf32>
    %cst_51 = arith.constant 1.000000e+00 : f32
    %198 = vector.broadcast %cst_51 : f32 to vector<2x32xf32>
    %199 = arith.addf %198, %197 : vector<2x32xf32>
    %200 = arith.divf %198, %199 : vector<2x32xf32>
    %201 = arith.mulf %192, %169 : vector<2x32xf32>
    %202 = arith.mulf %186, %194 : vector<2x32xf32>
    %203 = arith.addf %201, %202 : vector<2x32xf32>
    %204 = math.tanh %203 : vector<2x32xf32>
    %205 = arith.mulf %200, %204 : vector<2x32xf32>
    %c0_52 = arith.constant 0 : index
    %206 = arith.index_cast %c5_i32 : i32 to index
    %c0_53 = arith.constant 0 : index
    %207 = vector.load %arg4[%c0_52, %206, %c0_53] : memref<2x8x32xf32, #tpu.memory_space<vmem>>, vector<2x1x32xf32>
    %208 = vector.shape_cast %207 : vector<2x1x32xf32> to vector<2x32xf32>
    %209 = vector.shape_cast %205 : vector<2x32xf32> to vector<2x1x32xf32>
    tpu.vector_store %arg4[%c0_52, %206, %c0_53], %209 {strides = array<i32>} : memref<2x8x32xf32, #tpu.memory_space<vmem>>, vector<2x1x32xf32>,
    %c6_i32 = arith.constant 6 : i32
    %c0_54 = arith.constant 0 : index
    %210 = arith.index_cast %c6_i32 : i32 to index
    %c0_55 = arith.constant 0 : index
    %211 = vector.load %arg2[%c0_54, %210, %c0_55] : memref<2x8x128xf32, #tpu.memory_space<vmem>>, vector<2x1x128xf32>
    %212 = vector.shape_cast %211 : vector<2x1x128xf32> to vector<2x128xf32>
    %cst_56 = arith.constant dense<0.000000e+00> : vector<2x128xf32>
    %213 = tpu.matmul %205, %3, %cst_56 {dimension_numbers = #tpu.dot_dimension_numbers<[1], [0], [0], [1], [0, 0, 1, 1], [], []>} : vector<2x32xf32>, vector<32x128xf32>, vector<2x128xf32> -> vector<2x128xf32>
    %214 = arith.addf %212, %213 : vector<2x128xf32>
    %215 = vector.extract_strided_slice %214 {offsets = [0, 0], sizes = [2, 32], strides = [1, 1]} : vector<2x128xf32> to vector<2x32xf32>
    %216 = arith.negf %215 : vector<2x32xf32>
    %217 = math.exp %216 : vector<2x32xf32>
    %cst_57 = arith.constant 1.000000e+00 : f32
    %218 = vector.broadcast %cst_57 : f32 to vector<2x32xf32>
    %219 = arith.addf %218, %217 : vector<2x32xf32>
    %220 = arith.divf %218, %219 : vector<2x32xf32>
    %221 = vector.extract_strided_slice %214 {offsets = [0, 32], sizes = [2, 32], strides = [1, 1]} : vector<2x128xf32> to vector<2x32xf32>
    %222 = arith.negf %221 : vector<2x32xf32>
    %223 = math.exp %222 : vector<2x32xf32>
    %cst_58 = arith.constant 1.000000e+00 : f32
    %224 = vector.broadcast %cst_58 : f32 to vector<2x32xf32>
    %225 = arith.addf %224, %223 : vector<2x32xf32>
    %226 = arith.divf %224, %225 : vector<2x32xf32>
    %227 = vector.extract_strided_slice %214 {offsets = [0, 64], sizes = [2, 32], strides = [1, 1]} : vector<2x128xf32> to vector<2x32xf32>
    %228 = math.tanh %227 : vector<2x32xf32>
    %229 = vector.extract_strided_slice %214 {offsets = [0, 96], sizes = [2, 32], strides = [1, 1]} : vector<2x128xf32> to vector<2x32xf32>
    %230 = arith.negf %229 : vector<2x32xf32>
    %231 = math.exp %230 : vector<2x32xf32>
    %cst_59 = arith.constant 1.000000e+00 : f32
    %232 = vector.broadcast %cst_59 : f32 to vector<2x32xf32>
    %233 = arith.addf %232, %231 : vector<2x32xf32>
    %234 = arith.divf %232, %233 : vector<2x32xf32>
    %235 = arith.mulf %226, %203 : vector<2x32xf32>
    %236 = arith.mulf %220, %228 : vector<2x32xf32>
    %237 = arith.addf %235, %236 : vector<2x32xf32>
    %238 = math.tanh %237 : vector<2x32xf32>
    %239 = arith.mulf %234, %238 : vector<2x32xf32>
    %c0_60 = arith.constant 0 : index
    %240 = arith.index_cast %c6_i32 : i32 to index
    %c0_61 = arith.constant 0 : index
    %241 = vector.load %arg4[%c0_60, %240, %c0_61] : memref<2x8x32xf32, #tpu.memory_space<vmem>>, vector<2x1x32xf32>
    %242 = vector.shape_cast %241 : vector<2x1x32xf32> to vector<2x32xf32>
    %243 = vector.shape_cast %239 : vector<2x32xf32> to vector<2x1x32xf32>
    tpu.vector_store %arg4[%c0_60, %240, %c0_61], %243 {strides = array<i32>} : memref<2x8x32xf32, #tpu.memory_space<vmem>>, vector<2x1x32xf32>,
    %c7_i32 = arith.constant 7 : i32
    %c0_62 = arith.constant 0 : index
    %244 = arith.index_cast %c7_i32 : i32 to index
    %c0_63 = arith.constant 0 : index
    %245 = vector.load %arg2[%c0_62, %244, %c0_63] : memref<2x8x128xf32, #tpu.memory_space<vmem>>, vector<2x1x128xf32>
    %246 = vector.shape_cast %245 : vector<2x1x128xf32> to vector<2x128xf32>
    %cst_64 = arith.constant dense<0.000000e+00> : vector<2x128xf32>
    %247 = tpu.matmul %239, %3, %cst_64 {dimension_numbers = #tpu.dot_dimension_numbers<[1], [0], [0], [1], [0, 0, 1, 1], [], []>} : vector<2x32xf32>, vector<32x128xf32>, vector<2x128xf32> -> vector<2x128xf32>
    %248 = arith.addf %246, %247 : vector<2x128xf32>
    %249 = vector.extract_strided_slice %248 {offsets = [0, 0], sizes = [2, 32], strides = [1, 1]} : vector<2x128xf32> to vector<2x32xf32>
    %250 = arith.negf %249 : vector<2x32xf32>
    %251 = math.exp %250 : vector<2x32xf32>
    %cst_65 = arith.constant 1.000000e+00 : f32
    %252 = vector.broadcast %cst_65 : f32 to vector<2x32xf32>
    %253 = arith.addf %252, %251 : vector<2x32xf32>
    %254 = arith.divf %252, %253 : vector<2x32xf32>
    %255 = vector.extract_strided_slice %248 {offsets = [0, 32], sizes = [2, 32], strides = [1, 1]} : vector<2x128xf32> to vector<2x32xf32>
    %256 = arith.negf %255 : vector<2x32xf32>
    %257 = math.exp %256 : vector<2x32xf32>
    %cst_66 = arith.constant 1.000000e+00 : f32
    %258 = vector.broadcast %cst_66 : f32 to vector<2x32xf32>
    %259 = arith.addf %258, %257 : vector<2x32xf32>
    %260 = arith.divf %258, %259 : vector<2x32xf32>
    %261 = vector.extract_strided_slice %248 {offsets = [0, 64], sizes = [2, 32], strides = [1, 1]} : vector<2x128xf32> to vector<2x32xf32>
    %262 = math.tanh %261 : vector<2x32xf32>
    %263 = vector.extract_strided_slice %248 {offsets = [0, 96], sizes = [2, 32], strides = [1, 1]} : vector<2x128xf32> to vector<2x32xf32>
    %264 = arith.negf %263 : vector<2x32xf32>
    %265 = math.exp %264 : vector<2x32xf32>
    %cst_67 = arith.constant 1.000000e+00 : f32
    %266 = vector.broadcast %cst_67 : f32 to vector<2x32xf32>
    %267 = arith.addf %266, %265 : vector<2x32xf32>
    %268 = arith.divf %266, %267 : vector<2x32xf32>
    %269 = arith.mulf %260, %237 : vector<2x32xf32>
    %270 = arith.mulf %254, %262 : vector<2x32xf32>
    %271 = arith.addf %269, %270 : vector<2x32xf32>
    %272 = math.tanh %271 : vector<2x32xf32>
    %273 = arith.mulf %268, %272 : vector<2x32xf32>
    %c0_68 = arith.constant 0 : index
    %274 = arith.index_cast %c7_i32 : i32 to index
    %c0_69 = arith.constant 0 : index
    %275 = vector.load %arg4[%c0_68, %274, %c0_69] : memref<2x8x32xf32, #tpu.memory_space<vmem>>, vector<2x1x32xf32>
    %276 = vector.shape_cast %275 : vector<2x1x32xf32> to vector<2x32xf32>
    %277 = vector.shape_cast %273 : vector<2x32xf32> to vector<2x1x32xf32>
    tpu.vector_store %arg4[%c0_68, %274, %c0_69], %277 {strides = array<i32>} : memref<2x8x32xf32, #tpu.memory_space<vmem>>, vector<2x1x32xf32>,
    %c8_i32 = arith.constant 8 : i32
    %c0_70 = arith.constant 0 : index
    %c0_71 = arith.constant 0 : index
    %278 = vector.load %arg7[%c0_70, %c0_71] : memref<2x32xf32, #tpu.memory_space<vmem>>, vector<2x32xf32>
    tpu.vector_store %arg7[%c0_70, %c0_71], %273 {strides = array<i32>} : memref<2x32xf32, #tpu.memory_space<vmem>>, vector<2x32xf32>,
    %c0_72 = arith.constant 0 : index
    %c0_73 = arith.constant 0 : index
    %279 = vector.load %arg8[%c0_72, %c0_73] : memref<2x32xf32, #tpu.memory_space<vmem>>, vector<2x32xf32>
    tpu.vector_store %arg8[%c0_72, %c0_73], %271 {strides = array<i32>} : memref<2x32xf32, #tpu.memory_space<vmem>>, vector<2x32xf32>,
    %c0_i32_74 = arith.constant 0 : i32
    %280 = arith.cmpi eq, %arg1, %c0_i32_74 : i32
    %281 = arith.extui %280 : i1 to i32
    %c0_i32_75 = arith.constant 0 : i32
    %282 = arith.cmpi ne, %281, %c0_i32_75 : i32
    scf.if %282 {
      %c0_76 = arith.constant 0 : index
      %c0_77 = arith.constant 0 : index
      %283 = vector.load %arg5[%c0_76, %c0_77] : memref<2x32xf32, #tpu.memory_space<vmem>>, vector<2x32xf32>
      tpu.vector_store %arg5[%c0_76, %c0_77], %273 {strides = array<i32>} : memref<2x32xf32, #tpu.memory_space<vmem>>, vector<2x32xf32>,
      %c0_78 = arith.constant 0 : index
      %c0_79 = arith.constant 0 : index
      %284 = vector.load %arg6[%c0_78, %c0_79] : memref<2x32xf32, #tpu.memory_space<vmem>>, vector<2x32xf32>
      tpu.vector_store %arg6[%c0_78, %c0_79], %271 {strides = array<i32>} : memref<2x32xf32, #tpu.memory_space<vmem>>, vector<2x32xf32>,
    } else {
    }
    return
  }
  func.func @transform_0(%arg0: i32, %arg1: i32) -> (i32, i32, i32) {
    %c0_i32 = arith.constant 0 : i32
    %c0_i32_0 = arith.constant 0 : i32
    return %arg0, %arg1, %c0_i32 : i32, i32, i32
  }
  func.func @transform_1(%arg0: i32, %arg1: i32) -> (i32, i32) {
    %c0_i32 = arith.constant 0 : i32
    %c0_i32_0 = arith.constant 0 : i32
    %c0_i32_1 = arith.constant 0 : i32
    return %c0_i32, %c0_i32_0 : i32, i32
  }
  func.func @transform_2(%arg0: i32, %arg1: i32) -> (i32, i32, i32) {
    %c0_i32 = arith.constant 0 : i32
    %c0_i32_0 = arith.constant 0 : i32
    return %arg0, %arg1, %c0_i32 : i32, i32, i32
  }
  func.func @transform_3(%arg0: i32, %arg1: i32) -> (i32, i32) {
    %c0_i32 = arith.constant 0 : i32
    %c0_i32_0 = arith.constant 0 : i32
    return %arg0, %c0_i32 : i32, i32
  }
  func.func @transform_4(%arg0: i32, %arg1: i32) -> (i32, i32) {
    %c0_i32 = arith.constant 0 : i32
    %c0_i32_0 = arith.constant 0 : i32
    return %arg0, %c0_i32 : i32, i32
  }
}

</mosaic_0001>

<bundles_post_ra>
// kernel: tpu_custom_call.1
= control target key start
LH: loop header
LB: loop body
LE: loop exit
PB: predicated region body
PF: predicated region fallthrough
CT: control target
= control target key end

     0   :  { %10 = vsyncpa [#allocation5], 0  ;;  %s1660_s0 = inlined_call_operand.hbm [shape: f32[2,8,128], index: 0, kind: input, shape index: {}]   ;;  %s1661_s1 = inlined_call_operand.hbm [shape: f32[32,128], index: 1, kind: input, shape index: {}]   ;;  %s1662_s2 = inlined_call_operand.hbm [shape: f32[2,8,32], index: 2, kind: output, shape index: {0}]   ;;  %s1663_s3 = inlined_call_operand.hbm [shape: f32[2,32], index: 3, kind: output, shape index: {1}]   ;;  %s1664_s4 = inlined_call_operand.hbm [shape: f32[2,32], index: 4, kind: output, shape index: {2}]  }
   0x1   :  { %11 = vsyncpa [#allocation8], 0 }
   0x2   :  { %12 = vsyncpa [#allocation6], 0 }
   0x3   :  { %13 = vsyncpa [#allocation11], 0  ;;  %s18_s17 = sshll.u32 %s1660_s0, 4  ;;  %s1375_s18 = smov [#allocation4]   ;;  %s19_s17 = int_to_ptr.hbm [resolvable:$true] %s18_s17 }
   0x4   :  { %s20_s19 = sshll.u32 %s1375_s18, 4  ;;  %s31_s22 = sshll.u32 %s1661_s1, 4  ;;  %s21_s19 = int_to_ptr.vmem [resolvable:$true] %s20_s19  ;;  %s32_s22 = int_to_ptr.hbm [resolvable:$true] %s31_s22 }
   0x5   :  { %s1376_s23 = smov 128   ;;  %s1377_s24 = smov 8  }
   0x6   :  { %26 = dma.hbm_to_vmem [thread:$0]  %s19_s17, 256, %s21_s19, [#allocation5], %s1376_s23, %s1376_s23, %s1377_s24  }
   0x7   :  { %s1378_s25 = smov [#allocation7]  }
   0x8   :  { %s33_s26 = sshll.u32 %s1378_s25, 4  ;;  %s34_s26 = int_to_ptr.vmem [resolvable:$true] %s33_s26 }
   0x9   :  { %39 = dma.hbm_to_vmem [thread:$0]  %s32_s22, 512, %s34_s26, [#allocation8], %s1376_s23, %s1376_s23, %s1377_s24  }
   0xa   :  { %1367 = dma.done.wait [#allocation5], 256  }
   0xb   :  { %1368 = vsyncadd [#allocation5], 4294967040 }
   0xc   :  { %1369 = dma.done.wait [#allocation8], 512  }
   0xd   :  { %1370 = vsyncadd [#allocation8], 4294966784  ;;  %vm52_vm0 = vcmask 254976   ;;  %v1379_v0 = vmov 0.0   ;;  %v58_v1 = vld [vmem:[#allocation7 + $0x18] sm:$0xff]  ;;  %v57_v2 = vld [vmem:[#allocation7 + $0x10] sm:$0xff] }
   0xe   :  { %53 = vst.msk [vmem:[#allocation2] sm:$0x3] %vm52_vm0, %v1379_v0  ;;  %79 = vmatpush.msra.mxu0 %v58_v1  ;;  %207 = vmatpush.msra.mxu1 %v58_v1  ;;  %v56_v3 = vld [vmem:[#allocation7 + $0x8] sm:$0xff]  ;;  %v55_v6 = vld [vmem:[#allocation7] sm:$0xff]  ;;  %vm63_vm1 = vcmask 261120   ;;  %s1380_s0 = smov 32  }
   0xf   :  { %54 = vst.msk [vmem:[#allocation3] sm:$0x3] %vm52_vm0, %v1379_v0  ;;  %325 = vmatpush.msra.mxu2 %v58_v1  ;;  %443 = vmatpush.msra.mxu3 %v58_v1  ;;  %v62_v8 = vld [vmem:[#allocation4 + $0x8] sm:$0x1]  ;;  %v61_v12 = vld [vmem:[#allocation4] sm:$0x1] }
  0x10   :  { %80 = vmatpush.msra.mxu0 %v57_v2  ;;  %208 = vmatpush.msra.mxu1 %v57_v2  ;;  %s1381_s1 = smov 64   ;;  %vm189_vm10 = vcmask 1041409   ;;  %v186_v63 = vld [vmem:[#allocation4 + $0x1] sm:$0x1]  ;;  %v187_v0 = vld [vmem:[#allocation4 + $0x9] sm:$0x1] }
  0x11   :  { %326 = vmatpush.msra.mxu2 %v57_v2  ;;  %444 = vmatpush.msra.mxu3 %v57_v2  ;;  %s1382_s27 = smov 96   ;;  %s1383_s28 = smov [#allocation10]  }
  0x12   :  { %81 = vmatpush.msra.mxu0 %v56_v3  ;;  %209 = vmatpush.msra.mxu1 %v56_v3  ;;  %s1051_s29 = sshll.u32 %s1383_s28, 4  ;;  %s1053_s6 = sshll.u32 %s1663_s3, 4  ;;  %s1052_s29 = int_to_ptr.vmem [resolvable:$true] %s1051_s29  ;;  %s1054_s6 = int_to_ptr.hbm [resolvable:$true] %s1053_s6 }
  0x13   :  { %327 = vmatpush.msra.mxu2 %v56_v3  ;;  %445 = vmatpush.msra.mxu3 %v56_v3  ;;  %s1384_s7 = smov [#allocation12]   ;;  %s1064_s11 = sshll.u32 %s1664_s4, 4  ;;  %s1065_s11 = int_to_ptr.hbm [resolvable:$true] %s1064_s11 }
  0x14   :  { %82 = vmatpush.msra.mxu0 %v55_v6  ;;  %210 = vmatpush.msra.mxu1 %v55_v6  ;;  %s1062_s8 = sshll.u32 %s1384_s7, 4  ;;  %s1385_s3 = smov [#allocation9]   ;;  %s1063_s8 = int_to_ptr.vmem [resolvable:$true] %s1062_s8 }
  0x15   :  { %v59_v7 = vld [vmem:[#allocation2] sm:$0x3]  ;;  %328 = vmatpush.msra.mxu2 %v55_v6  ;;  %446 = vmatpush.msra.mxu3 %v55_v6  ;;  %s1037_s12 = sshll.u32 %s1385_s3, 4  ;;  %s1039_s15 = sshll.u32 %s1662_s2, 4  ;;  %s1038_s12 = int_to_ptr.vmem [resolvable:$true] %s1037_s12  ;;  %s1040_s15 = int_to_ptr.hbm [resolvable:$true] %s1039_s15 }
  0x16   :  { %v60_v4 = vld [vmem:[#allocation3] sm:$0x3]  ;;  %1084 = vmatmul.msk.f32.vlgmr.msra.gmra.mxu0 %vm63_vm1, %v59_v7  ;;  %679 = vmatpush.msrb.mxu1 %v58_v1 }
  0x17   :  { %v134_v5 = vrot.slane %v60_v4, 1  ;;  %561 = vmatpush.msrb.mxu0 %v58_v1  ;;  %797 = vmatpush.msrb.mxu2 %v58_v1 }
  0x18   :  { %915 = vmatpush.msrb.mxu3 %v58_v1  ;;  %680 = vmatpush.msrb.mxu1 %v57_v2 }
  0x19   :  { %137 = vrot.lane.b32.xlu1 %v134_v5, %s1380_s0  ;;  %562 = vmatpush.msrb.mxu0 %v57_v2 }
  0x1a   :  { %798 = vmatpush.msrb.mxu2 %v57_v2  ;;  %681 = vmatpush.msrb.mxu1 %v56_v3 }
  0x1b   :  { %563 = vmatpush.msrb.mxu0 %v56_v3  ;;  %916 = vmatpush.msrb.mxu3 %v57_v2 }
  0x1c   :  { %799 = vmatpush.msrb.mxu2 %v56_v3  ;;  %682 = vmatpush.msrb.mxu1 %v55_v6 }
  0x1d   :  { %564 = vmatpush.msrb.mxu0 %v55_v6  ;;  %917 = vmatpush.msrb.mxu3 %v56_v3 }
  0x1e   :  { %800 = vmatpush.msrb.mxu2 %v55_v6 }
  0x1f   :  { %918 = vmatpush.msrb.mxu3 %v55_v6 }
  0x21   :  { %135 = vrot.lane.b32.xlu1 %v60_v4, %s1380_s0 }
  0x8b   :  { %v138_v46 = vpop.permute.xlu1 %137 }
  0x93   :  { %v84_v9 = vpop.f32.mrf.mxu0  ;;  %v136_v50 = vpop.permute.xlu1 %135 }
  0x94   :  { %v88_v10 = vrot.slane %v84_v9, 1  ;;  %v91_v13 = vadd.f32 %v84_v9, %v61_v12 }
  0x96   :  { %v92_v11 = vadd.f32 %v88_v10, %v62_v8  ;;  %v1085_v17 = vmul.f32 -1.442695, %v91_v13 }
  0x98   :  { %1119 = vtanh.f32 %v92_v11  ;;  %v1086_v16 = vmul.f32 -1.442695, %v92_v11 }
  0x99   :  { %1121 = vtanh.f32 %v91_v13 }
  0x9a   :  { %1123 = vpow2.f32 %v1086_v16 }
  0x9b   :  { %1125 = vpow2.f32 %v1085_v17 }
  0x9e   :  { %v1120_v14 = vpop.eup %1119 }
  0x9f   :  { %147 = vrot.lane.b32.xlu0 %v1120_v14, %s1381_s1  ;;  %v1122_v15 = vpop.eup %1121 }
  0xa0   :  { %v1124_v18 = vpop.eup %1123 }
  0xa1   :  { %v100_v19 = vadd.f32 1.0, %v1124_v18  ;;  %v1126_v20 = vpop.eup %1125 }
  0xa2   :  { %v99_v21 = vadd.f32 1.0, %v1126_v20 }
  0xa3   :  { %1127 = vrcp.f32 %v100_v19  ;;  %v127_v30 = vand.u32 2147483648, %v100_v19  ;;  %vm121_vm3 = vweird.f32 %v100_v19  ;;  %v125_v31 = vand.u32 2147483647, %v100_v19 }
  0xa4   :  { %1129 = vrcp.f32 %v99_v21  ;;  %v112_v39 = vand.u32 2147483648, %v99_v21  ;;  %vm106_vm7 = vweird.f32 %v99_v21  ;;  %v110_v40 = vand.u32 2147483647, %v99_v21 }
  0xa5   :  { %v128_v34 = vor.u32 1.1754944e-38, %v127_v30  ;;  %vm126_vm5 = vcmp.eq.f32.partialorder %v125_v31, 8.507059e+37 }
  0xa6   :  { %v113_v42 = vor.u32 1.1754944e-38, %v112_v39  ;;  %vm111_vm9 = vcmp.eq.f32.partialorder %v110_v40, 8.507059e+37 }
  0xa7   :  { %145 = vrot.lane.b32.xlu0 %v1122_v15, %s1381_s1 }
  0xa9   :  { %v1128_v22 = vpop.eup %1127 }
  0xaa   :  { %v117_v23 = vmul.f32 %v1128_v22, %v100_v19  ;;  %v1130_v25 = vpop.eup %1129  ;;  %vm122_vm2 = vweird.f32 %v1128_v22 }
  0xab   :  { %v102_v27 = vmul.f32 %v1130_v25, %v99_v21  ;;  %vm123_vm4 = vmor %vm121_vm3, %vm122_vm2  ;;  %vm107_vm6 = vweird.f32 %v1130_v25 }
  0xac   :  { %v118_v24 = vsub.f32 1.0, %v117_v23  ;;  %vm108_vm8 = vmor %vm106_vm7, %vm107_vm6 }
  0xad   :  { %v103_v29 = vsub.f32 1.0, %v102_v27 }
  0xae   :  { %v119_v26 = vmul.f32 %v1128_v22, %v118_v24 }
  0xaf   :  { %v104_v33 = vmul.f32 %v1130_v25, %v103_v29 }
  0xb0   :  { %v120_v28 = vadd.f32 %v1128_v22, %v119_v26 }
  0xb1   :  { %v105_v37 = vadd.f32 %v1130_v25, %v104_v33 }
  0xb2   :  { %v124_v32 = vsel %vm123_vm4, %v1128_v22, %v120_v28 }
  0xb3   :  { %v129_v35 = vsel %vm126_vm5, %v128_v34, %v124_v32  ;;  %v109_v41 = vsel %vm108_vm8, %v1130_v25, %v105_v37 }
  0xb4   :  { %v114_v43 = vsel %vm111_vm9, %v113_v42, %v109_v41  ;;  %v142_v47 = vmul.f32 %v138_v46, %v129_v35 }
  0xb5   :  { %v141_v51 = vmul.f32 %v136_v50, %v114_v43 }
 0x111   :  { %v148_v36 = vpop.permute.xlu0 %147 }
 0x112   :  { %v152_v38 = vmul.f32 %v148_v36, %v129_v35 }
 0x114   :  { %157 = vrot.lane.b32.xlu2 %v152_v38, %s1380_s0 }
 0x119   :  { %v146_v44 = vpop.permute.xlu0 %145 }
 0x11a   :  { %v151_v45 = vmul.f32 %v146_v44, %v114_v43 }
 0x11c   :  { %155 = vrot.lane.b32.xlu2 %v151_v45, %s1380_s0 }
 0x16e   :  { %v158_v48 = vpop.permute.xlu2 %157 }
 0x16f   :  { %v1432_v49 = vadd.f32 %v158_v48, %v142_v47 }
 0x171   :  { %1131 = vtanh.f32 %v1432_v49 }
 0x176   :  { %v156_v52 = vpop.permute.xlu2 %155 }
 0x177   :  { %v1132_v53 = vpop.eup %1131  ;;  %v1435_v54 = vadd.f32 %v156_v52, %v141_v51  ;;  %v305_v52 = vld [vmem:[#allocation4 + $0x2] sm:$0x1] }
 0x178   :  { %169 = vrot.lane.b32.xlu0 %v1132_v53, %s1381_s1  ;;  %v306_v53 = vld [vmem:[#allocation4 + $0xa] sm:$0x1] }
 0x179   :  { %1133 = vtanh.f32 %v1435_v54 }
 0x17f   :  { %v1134_v55 = vpop.eup %1133 }
 0x180   :  { %167 = vrot.lane.b32.xlu1 %v1134_v55, %s1381_s1 }
 0x1ea   :  { %v170_v56 = vpop.permute.xlu0 %169 }
 0x1eb   :  { %v1440_v57 = vmul.f32 %v170_v56, %v129_v35 }
 0x1ed   :  { %v188_v59 = vrot.slane %v1440_v57, 7 }
 0x1f2   :  { %v168_v58 = vpop.permute.xlu1 %167 }
 0x1f3   :  { %v1443_v60 = vmul.f32 %v168_v58, %v114_v43 }
 0x1f5   :  { %v190_v61 = vsel %vm189_vm10, %v188_v59, %v1443_v60 }
 0x1f6   :  { %191 = vrot.lane.b32.xlu2 %v190_v61, %s1380_s0 }
 0x250   :  { %v192_v62 = vpop.permute.xlu2 %191 }
 0x251   :  { %1087 = vmatmul.msk.f32.vlgmr.msra.gmra.mxu1 %vm63_vm1, %v192_v62 }
 0x2ce   :  { %v212_v1 = vpop.f32.mrf.mxu1 }
 0x2cf   :  { %v216_v2 = vrot.slane %v212_v1, 1  ;;  %v219_v3 = vadd.f32 %v212_v1, %v186_v63 }
 0x2d1   :  { %v220_v4 = vadd.f32 %v216_v2, %v187_v0  ;;  %1135 = vtanh.f32 %v219_v3  ;;  %v1088_v7 = vmul.f32 -1.442695, %v219_v3 }
 0x2d3   :  { %1137 = vtanh.f32 %v220_v4  ;;  %v1089_v8 = vmul.f32 -1.442695, %v220_v4 }
 0x2d4   :  { %1139 = vpow2.f32 %v1088_v7 }
 0x2d5   :  { %1141 = vpow2.f32 %v1089_v8 }
 0x2d7   :  { %v1136_v5 = vpop.eup %1135 }
 0x2d8   :  { %265 = vrot.lane.b32.xlu1 %v1136_v5, %s1381_s1 }
 0x2d9   :  { %v1138_v6 = vpop.eup %1137 }
 0x2da   :  { %267 = vrot.lane.b32.xlu0 %v1138_v6, %s1381_s1  ;;  %v1140_v9 = vpop.eup %1139 }
 0x2db   :  { %v1142_v10 = vpop.eup %1141  ;;  %v227_v11 = vadd.f32 1.0, %v1140_v9 }
 0x2dc   :  { %v228_v12 = vadd.f32 1.0, %v1142_v10 }
 0x2dd   :  { %1143 = vrcp.f32 %v227_v11  ;;  %v240_v22 = vand.u32 2147483648, %v227_v11  ;;  %vm234_vm12 = vweird.f32 %v227_v11  ;;  %v238_v23 = vand.u32 2147483647, %v227_v11 }
 0x2de   :  { %1145 = vrcp.f32 %v228_v12  ;;  %v255_v26 = vand.u32 2147483648, %v228_v12  ;;  %vm249_vm15 = vweird.f32 %v228_v12  ;;  %v253_v28 = vand.u32 2147483647, %v228_v12 }
 0x2df   :  { %v241_v27 = vor.u32 1.1754944e-38, %v240_v22  ;;  %vm239_vm2 = vcmp.eq.f32.partialorder %v238_v23, 8.507059e+37 }
 0x2e0   :  { %v256_v33 = vor.u32 1.1754944e-38, %v255_v26  ;;  %vm254_vm4 = vcmp.eq.f32.partialorder %v253_v28, 8.507059e+37 }
 0x2e3   :  { %v1144_v13 = vpop.eup %1143 }
 0x2e4   :  { %v1146_v14 = vpop.eup %1145  ;;  %v230_v15 = vmul.f32 %v1144_v13, %v227_v11  ;;  %vm235_vm11 = vweird.f32 %v1144_v13 }
 0x2e5   :  { %v245_v16 = vmul.f32 %v1146_v14, %v228_v12  ;;  %vm236_vm13 = vmor %vm234_vm12, %vm235_vm11  ;;  %vm250_vm14 = vweird.f32 %v1146_v14 }
 0x2e6   :  { %v231_v17 = vsub.f32 1.0, %v230_v15  ;;  %vm251_vm3 = vmor %vm249_vm15, %vm250_vm14 }
 0x2e7   :  { %v246_v18 = vsub.f32 1.0, %v245_v16 }
 0x2e8   :  { %v232_v19 = vmul.f32 %v1144_v13, %v231_v17 }
 0x2e9   :  { %v247_v20 = vmul.f32 %v1146_v14, %v246_v18 }
 0x2ea   :  { %v233_v21 = vadd.f32 %v1144_v13, %v232_v19 }
 0x2eb   :  { %v248_v24 = vadd.f32 %v1146_v14, %v247_v20 }
 0x2ec   :  { %v237_v25 = vsel %vm236_vm13, %v1144_v13, %v233_v21 }
 0x2ed   :  { %v242_v30 = vsel %vm239_vm2, %v241_v27, %v237_v25  ;;  %v252_v31 = vsel %vm251_vm3, %v1146_v14, %v248_v24 }
 0x2ee   :  { %v257_v35 = vsel %vm254_vm4, %v256_v33, %v252_v31  ;;  %v261_v41 = vmul.f32 %v242_v30, %v1435_v54 }
 0x2ef   :  { %v262_v37 = vmul.f32 %v257_v35, %v1432_v49 }
 0x34a   :  { %v266_v29 = vpop.permute.xlu1 %265 }
 0x34b   :  { %v271_v32 = vmul.f32 %v266_v29, %v242_v30 }
 0x34c   :  { %v268_v34 = vpop.permute.xlu0 %267 }
 0x34d   :  { %275 = vrot.lane.b32.xlu0 %v271_v32, %s1380_s0  ;;  %v272_v36 = vmul.f32 %v268_v34, %v257_v35 }
 0x34f   :  { %277 = vrot.lane.b32.xlu2 %v272_v36, %s1380_s0 }
 0x3a9   :  { %v278_v38 = vpop.permute.xlu2 %277 }
 0x3aa   :  { %v1454_v39 = vadd.f32 %v278_v38, %v262_v37 }
 0x3ac   :  { %1147 = vtanh.f32 %v1454_v39 }
 0x3b2   :  { %v1148_v40 = vpop.eup %1147 }
 0x3b3   :  { %289 = vrot.lane.b32.xlu1 %v1148_v40, %s1381_s1 }
 0x3bf   :  { %v276_v42 = vpop.permute.xlu0 %275 }
 0x3c0   :  { %v1459_v43 = vadd.f32 %v276_v42, %v261_v41 }
 0x3c2   :  { %1149 = vtanh.f32 %v1459_v43 }
 0x3c8   :  { %v1150_v44 = vpop.eup %1149 }
 0x3c9   :  { %287 = vrot.lane.b32.xlu2 %v1150_v44, %s1381_s1  ;;  %v424_v44 = vld [vmem:[#allocation4 + $0xb] sm:$0x1] }
 0x423   :  { %v288_v45 = vpop.permute.xlu2 %287 }
 0x424   :  { %v1465_v48 = vmul.f32 %v288_v45, %v242_v30 }
 0x425   :  { %v290_v46 = vpop.permute.xlu1 %289 }
 0x426   :  { %v1463_v47 = vmul.f32 %v290_v46, %v257_v35 }
 0x428   :  { %v307_v49 = vrot.slane %v1463_v47, 7 }
 0x42a   :  { %v308_v50 = vsel %vm189_vm10, %v307_v49, %v1465_v48 }
 0x42b   :  { %309 = vrot.lane.b32.xlu0 %v308_v50, %s1380_s0 }
 0x49d   :  { %v310_v51 = vpop.permute.xlu0 %309 }
 0x49e   :  { %1090 = vmatmul.msk.f32.vlgmr.msra.gmra.mxu2 %vm63_vm1, %v310_v51 }
 0x521   :  { %v330_v54 = vpop.f32.mrf.mxu2 }
 0x522   :  { %v334_v55 = vrot.slane %v330_v54, 1  ;;  %v337_v56 = vadd.f32 %v330_v54, %v305_v52 }
 0x524   :  { %v338_v58 = vadd.f32 %v334_v55, %v306_v53  ;;  %1151 = vtanh.f32 %v337_v56  ;;  %v1091_v62 = vmul.f32 -1.442695, %v337_v56 }
 0x526   :  { %1153 = vtanh.f32 %v338_v58  ;;  %v1092_v3 = vmul.f32 -1.442695, %v338_v58 }
 0x527   :  { %1155 = vpow2.f32 %v1091_v62 }
 0x52a   :  { %v1152_v59 = vpop.eup %1151 }
 0x52b   :  { %383 = vrot.lane.b32.xlu2 %v1152_v59, %s1381_s1 }
 0x52c   :  { %v1154_v61 = vpop.eup %1153 }
 0x52d   :  { %385 = vrot.lane.b32.xlu1 %v1154_v61, %s1381_s1  ;;  %v1156_v63 = vpop.eup %1155 }
 0x52e   :  { %v345_v0 = vadd.f32 1.0, %v1156_v63 }
 0x530   :  { %1157 = vrcp.f32 %v345_v0  ;;  %v358_v8 = vand.u32 2147483648, %v345_v0  ;;  %vm352_vm6 = vweird.f32 %v345_v0  ;;  %v356_v10 = vand.u32 2147483647, %v345_v0 }
 0x531   :  { %1159 = vpow2.f32 %v1092_v3 }
 0x532   :  { %v359_v12 = vor.u32 1.1754944e-38, %v358_v8  ;;  %vm357_vm8 = vcmp.eq.f32.partialorder %v356_v10, 8.507059e+37 }
 0x536   :  { %v1158_v1 = vpop.eup %1157 }
 0x537   :  { %v348_v2 = vmul.f32 %v1158_v1, %v345_v0  ;;  %v1160_v6 = vpop.eup %1159  ;;  %vm353_vm5 = vweird.f32 %v1158_v1 }
 0x538   :  { %v346_v9 = vadd.f32 1.0, %v1160_v6  ;;  %vm354_vm7 = vmor %vm352_vm6, %vm353_vm5 }
 0x539   :  { %v349_v4 = vsub.f32 1.0, %v348_v2 }
 0x53a   :  { %1161 = vrcp.f32 %v346_v9  ;;  %v373_v21 = vand.u32 2147483648, %v346_v9  ;;  %vm367_vm11 = vweird.f32 %v346_v9  ;;  %v371_v22 = vand.u32 2147483647, %v346_v9 }
 0x53b   :  { %v350_v5 = vmul.f32 %v1158_v1, %v349_v4 }
 0x53c   :  { %v374_v24 = vor.u32 1.1754944e-38, %v373_v21  ;;  %vm372_vm13 = vcmp.eq.f32.partialorder %v371_v22, 8.507059e+37 }
 0x53d   :  { %v351_v7 = vadd.f32 %v1158_v1, %v350_v5 }
 0x53f   :  { %v355_v11 = vsel %vm354_vm7, %v1158_v1, %v351_v7 }
 0x540   :  { %v360_v14 = vsel %vm357_vm8, %v359_v12, %v355_v11  ;;  %v1162_v16 = vpop.eup %1161 }
 0x541   :  { %v363_v17 = vmul.f32 %v1162_v16, %v346_v9  ;;  %vm368_vm9 = vweird.f32 %v1162_v16  ;;  %v379_v28 = vmul.f32 %v360_v14, %v1459_v43  ;;  %v423_v43 = vld [vmem:[#allocation4 + $0x3] sm:$0x1] }
 0x542   :  { %vm369_vm12 = vmor %vm367_vm11, %vm368_vm9 }
 0x543   :  { %v364_v18 = vsub.f32 1.0, %v363_v17 }
 0x545   :  { %v365_v19 = vmul.f32 %v1162_v16, %v364_v18 }
 0x547   :  { %v366_v20 = vadd.f32 %v1162_v16, %v365_v19 }
 0x549   :  { %v370_v23 = vsel %vm369_vm12, %v1162_v16, %v366_v20 }
 0x54a   :  { %v375_v26 = vsel %vm372_vm13, %v374_v24, %v370_v23 }
 0x54b   :  { %v380_v32 = vmul.f32 %v375_v26, %v1454_v39 }
 0x585   :  { %v384_v13 = vpop.permute.xlu2 %383 }
 0x586   :  { %v389_v15 = vmul.f32 %v384_v13, %v360_v14 }
 0x588   :  { %393 = vrot.lane.b32.xlu1 %v389_v15, %s1380_s0 }
 0x59f   :  { %v386_v25 = vpop.permute.xlu1 %385 }
 0x5a0   :  { %v390_v27 = vmul.f32 %v386_v25, %v375_v26 }
 0x5a2   :  { %395 = vrot.lane.b32.xlu0 %v390_v27, %s1380_s0 }
 0x5fa   :  { %v394_v29 = vpop.permute.xlu1 %393 }
 0x5fb   :  { %v1477_v30 = vadd.f32 %v394_v29, %v379_v28 }
 0x5fd   :  { %1163 = vtanh.f32 %v1477_v30 }
 0x603   :  { %v1164_v31 = vpop.eup %1163 }
 0x604   :  { %405 = vrot.lane.b32.xlu0 %v1164_v31, %s1381_s1 }
 0x614   :  { %v396_v33 = vpop.permute.xlu0 %395 }
 0x615   :  { %v1482_v34 = vadd.f32 %v396_v33, %v380_v32 }
 0x617   :  { %1165 = vtanh.f32 %v1482_v34 }
 0x61d   :  { %v1166_v35 = vpop.eup %1165 }
 0x61e   :  { %407 = vrot.lane.b32.xlu2 %v1166_v35, %s1381_s1 }
 0x676   :  { %v406_v36 = vpop.permute.xlu0 %405 }
 0x677   :  { %v1488_v40 = vmul.f32 %v406_v36, %v360_v14  ;;  %v541_v36 = vld [vmem:[#allocation4 + $0x4] sm:$0x1] }
 0x678   :  { %v408_v37 = vpop.permute.xlu2 %407 }
 0x679   :  { %v1486_v38 = vmul.f32 %v408_v37, %v375_v26  ;;  %v542_v37 = vld [vmem:[#allocation4 + $0xc] sm:$0x1] }
 0x67b   :  { %v425_v41 = vrot.slane %v1486_v38, 7 }
 0x67d   :  { %v426_v42 = vsel %vm189_vm10, %v425_v41, %v1488_v40 }
 0x67e   :  { %427 = vrot.lane.b32.xlu1 %v426_v42, %s1380_s0 }
 0x6f0   :  { %v428_v39 = vpop.permute.xlu1 %427 }
 0x6f1   :  { %1093 = vmatmul.msk.f32.vlgmr.msra.gmra.mxu3 %vm63_vm1, %v428_v39 }
 0x774   :  { %v448_v45 = vpop.f32.mrf.mxu3 }
 0x775   :  { %v452_v46 = vrot.slane %v448_v45, 1  ;;  %v455_v49 = vadd.f32 %v448_v45, %v423_v43 }
 0x777   :  { %v456_v50 = vadd.f32 %v452_v46, %v424_v44  ;;  %1167 = vtanh.f32 %v455_v49  ;;  %v1094_v56 = vmul.f32 -1.442695, %v455_v49 }
 0x779   :  { %1169 = vtanh.f32 %v456_v50  ;;  %v1095_v53 = vmul.f32 -1.442695, %v456_v50 }
 0x77b   :  { %1171 = vpow2.f32 %v1095_v53 }
 0x77d   :  { %v1168_v51 = vpop.eup %1167 }
 0x77e   :  { %501 = vrot.lane.b32.xlu0 %v1168_v51, %s1381_s1 }
 0x77f   :  { %v1170_v52 = vpop.eup %1169 }
 0x780   :  { %503 = vrot.lane.b32.xlu2 %v1170_v52, %s1381_s1 }
 0x781   :  { %v1172_v54 = vpop.eup %1171 }
 0x782   :  { %v464_v55 = vadd.f32 1.0, %v1172_v54 }
 0x784   :  { %1173 = vrcp.f32 %v464_v55  ;;  %v491_v2 = vand.u32 2147483648, %v464_v55  ;;  %vm485_vm15 = vweird.f32 %v464_v55  ;;  %v489_v3 = vand.u32 2147483647, %v464_v55 }
 0x785   :  { %1175 = vpow2.f32 %v1094_v56 }
 0x786   :  { %v492_v5 = vor.u32 1.1754944e-38, %v491_v2  ;;  %vm490_vm3 = vcmp.eq.f32.partialorder %v489_v3, 8.507059e+37 }
 0x78a   :  { %v1174_v58 = vpop.eup %1173 }
 0x78b   :  { %v481_v59 = vmul.f32 %v1174_v58, %v464_v55  ;;  %v1176_v62 = vpop.eup %1175  ;;  %vm486_vm14 = vweird.f32 %v1174_v58 }
 0x78c   :  { %v463_v63 = vadd.f32 1.0, %v1176_v62  ;;  %vm487_vm2 = vmor %vm485_vm15, %vm486_vm14 }
 0x78d   :  { %v482_v61 = vsub.f32 1.0, %v481_v59 }
 0x78e   :  { %1177 = vrcp.f32 %v463_v63  ;;  %v476_v14 = vand.u32 2147483648, %v463_v63  ;;  %vm470_vm5 = vweird.f32 %v463_v63  ;;  %v474_v15 = vand.u32 2147483647, %v463_v63 }
 0x78f   :  { %v483_v0 = vmul.f32 %v1174_v58, %v482_v61 }
 0x790   :  { %v477_v17 = vor.u32 1.1754944e-38, %v476_v14  ;;  %vm475_vm7 = vcmp.eq.f32.partialorder %v474_v15, 8.507059e+37 }
 0x791   :  { %v484_v1 = vadd.f32 %v1174_v58, %v483_v0 }
 0x793   :  { %v488_v4 = vsel %vm487_vm2, %v1174_v58, %v484_v1 }
 0x794   :  { %v1178_v6 = vpop.eup %1177  ;;  %v493_v8 = vsel %vm490_vm3, %v492_v5, %v488_v4 }
 0x795   :  { %v466_v10 = vmul.f32 %v1178_v6, %v463_v63  ;;  %vm471_vm4 = vweird.f32 %v1178_v6  ;;  %v498_v24 = vmul.f32 %v493_v8, %v1482_v34 }
 0x796   :  { %vm472_vm6 = vmor %vm470_vm5, %vm471_vm4 }
 0x797   :  { %v467_v11 = vsub.f32 1.0, %v466_v10 }
 0x799   :  { %v468_v12 = vmul.f32 %v1178_v6, %v467_v11 }
 0x79b   :  { %v469_v13 = vadd.f32 %v1178_v6, %v468_v12 }
 0x79d   :  { %v473_v16 = vsel %vm472_vm6, %v1178_v6, %v469_v13 }
 0x79e   :  { %v478_v19 = vsel %vm475_vm7, %v477_v17, %v473_v16 }
 0x79f   :  { %v497_v21 = vmul.f32 %v478_v19, %v1477_v30 }
 0x7da   :  { %v504_v7 = vpop.permute.xlu2 %503 }
 0x7db   :  { %v508_v9 = vmul.f32 %v504_v7, %v493_v8 }
 0x7dd   :  { %513 = vrot.lane.b32.xlu1 %v508_v9, %s1380_s0 }
 0x7f0   :  { %v502_v18 = vpop.permute.xlu0 %501 }
 0x7f1   :  { %v507_v20 = vmul.f32 %v502_v18, %v478_v19 }
 0x7f3   :  { %511 = vrot.lane.b32.xlu2 %v507_v20, %s1380_s0 }
 0x84d   :  { %v512_v22 = vpop.permute.xlu2 %511 }
 0x84e   :  { %v1500_v23 = vadd.f32 %v512_v22, %v497_v21 }
 0x84f   :  { %v514_v25 = vpop.permute.xlu1 %513 }
 0x850   :  { %1179 = vtanh.f32 %v1500_v23  ;;  %v1504_v26 = vadd.f32 %v514_v25, %v498_v24 }
 0x852   :  { %1181 = vtanh.f32 %v1504_v26 }
 0x856   :  { %v1180_v27 = vpop.eup %1179 }
 0x857   :  { %523 = vrot.lane.b32.xlu1 %v1180_v27, %s1381_s1 }
 0x858   :  { %v1182_v28 = vpop.eup %1181 }
 0x859   :  { %525 = vrot.lane.b32.xlu0 %v1182_v28, %s1381_s1 }
 0x8c9   :  { %v524_v29 = vpop.permute.xlu1 %523 }
 0x8ca   :  { %v1511_v32 = vmul.f32 %v524_v29, %v478_v19 }
 0x8cb   :  { %v526_v30 = vpop.permute.xlu0 %525 }
 0x8cc   :  { %v1509_v31 = vmul.f32 %v526_v30, %v493_v8 }
 0x8ce   :  { %v543_v33 = vrot.slane %v1509_v31, 7 }
 0x8d0   :  { %v544_v34 = vsel %vm189_vm10, %v543_v33, %v1511_v32  ;;  %v659_v33 = vld [vmem:[#allocation4 + $0x5] sm:$0x1] }
 0x8d1   :  { %545 = vrot.lane.b32.xlu2 %v544_v34, %s1380_s0  ;;  %v660_v34 = vld [vmem:[#allocation4 + $0xd] sm:$0x1] }
 0x92b   :  { %v546_v35 = vpop.permute.xlu2 %545 }
 0x92c   :  { %1096 = vmatmul.msk.f32.vlgmr.msrb.gmra.mxu0 %vm63_vm1, %v546_v35 }
 0x9a9   :  { %v566_v41 = vpop.f32.mrf.mxu0 }
 0x9aa   :  { %v570_v42 = vrot.slane %v566_v41, 1  ;;  %v573_v39 = vadd.f32 %v566_v41, %v541_v36 }
 0x9ac   :  { %v574_v43 = vadd.f32 %v570_v42, %v542_v37  ;;  %1183 = vtanh.f32 %v573_v39  ;;  %v1097_v46 = vmul.f32 -1.442695, %v573_v39 }
 0x9ae   :  { %1185 = vtanh.f32 %v574_v43  ;;  %v1098_v49 = vmul.f32 -1.442695, %v574_v43 }
 0x9af   :  { %1187 = vpow2.f32 %v1097_v46 }
 0x9b0   :  { %1189 = vpow2.f32 %v1098_v49 }
 0x9b2   :  { %v1184_v44 = vpop.eup %1183 }
 0x9b3   :  { %619 = vrot.lane.b32.xlu1 %v1184_v44, %s1381_s1 }
 0x9b4   :  { %v1186_v45 = vpop.eup %1185 }
 0x9b5   :  { %621 = vrot.lane.b32.xlu0 %v1186_v45, %s1381_s1  ;;  %v1188_v50 = vpop.eup %1187 }
 0x9b6   :  { %v1190_v51 = vpop.eup %1189  ;;  %v581_v52 = vadd.f32 1.0, %v1188_v50 }
 0x9b7   :  { %v582_v53 = vadd.f32 1.0, %v1190_v51 }
 0x9b8   :  { %1191 = vrcp.f32 %v581_v52  ;;  %v594_v1 = vand.u32 2147483648, %v581_v52  ;;  %vm588_vm9 = vweird.f32 %v581_v52  ;;  %v592_v2 = vand.u32 2147483647, %v581_v52 }
 0x9b9   :  { %1193 = vrcp.f32 %v582_v53  ;;  %v609_v5 = vand.u32 2147483648, %v582_v53  ;;  %vm603_vm13 = vweird.f32 %v582_v53  ;;  %v607_v7 = vand.u32 2147483647, %v582_v53 }
 0x9ba   :  { %v595_v6 = vor.u32 1.1754944e-38, %v594_v1  ;;  %vm593_vm14 = vcmp.eq.f32.partialorder %v592_v2, 8.507059e+37 }
 0x9bb   :  { %v610_v12 = vor.u32 1.1754944e-38, %v609_v5  ;;  %vm608_vm2 = vcmp.eq.f32.partialorder %v607_v7, 8.507059e+37 }
 0x9be   :  { %v1192_v54 = vpop.eup %1191 }
 0x9bf   :  { %v1194_v55 = vpop.eup %1193  ;;  %v584_v56 = vmul.f32 %v1192_v54, %v581_v52  ;;  %vm589_vm8 = vweird.f32 %v1192_v54 }
 0x9c0   :  { %v599_v58 = vmul.f32 %v1194_v55, %v582_v53  ;;  %vm590_vm11 = vmor %vm588_vm9, %vm589_vm8  ;;  %vm604_vm12 = vweird.f32 %v1194_v55 }
 0x9c1   :  { %v585_v59 = vsub.f32 1.0, %v584_v56  ;;  %vm605_vm15 = vmor %vm603_vm13, %vm604_vm12 }
 0x9c2   :  { %v600_v61 = vsub.f32 1.0, %v599_v58 }
 0x9c3   :  { %v586_v62 = vmul.f32 %v1192_v54, %v585_v59 }
 0x9c4   :  { %v601_v63 = vmul.f32 %v1194_v55, %v600_v61 }
 0x9c5   :  { %v587_v0 = vadd.f32 %v1192_v54, %v586_v62 }
 0x9c6   :  { %v602_v3 = vadd.f32 %v1194_v55, %v601_v63 }
 0x9c7   :  { %v591_v4 = vsel %vm590_vm11, %v1192_v54, %v587_v0 }
 0x9c8   :  { %v596_v9 = vsel %vm593_vm14, %v595_v6, %v591_v4  ;;  %v606_v10 = vsel %vm605_vm15, %v1194_v55, %v602_v3 }
 0x9c9   :  { %v611_v14 = vsel %vm608_vm2, %v610_v12, %v606_v10  ;;  %v615_v20 = vmul.f32 %v596_v9, %v1500_v23 }
 0x9ca   :  { %v616_v16 = vmul.f32 %v611_v14, %v1504_v26 }
 0xa25   :  { %v620_v8 = vpop.permute.xlu1 %619 }
 0xa26   :  { %v625_v11 = vmul.f32 %v620_v8, %v596_v9 }
 0xa27   :  { %v622_v13 = vpop.permute.xlu0 %621 }
 0xa28   :  { %629 = vrot.lane.b32.xlu0 %v625_v11, %s1380_s0  ;;  %v626_v15 = vmul.f32 %v622_v13, %v611_v14 }
 0xa2a   :  { %631 = vrot.lane.b32.xlu2 %v626_v15, %s1380_s0 }
 0xa84   :  { %v632_v17 = vpop.permute.xlu2 %631 }
 0xa85   :  { %v1523_v18 = vadd.f32 %v632_v17, %v616_v16 }
 0xa87   :  { %1195 = vtanh.f32 %v1523_v18 }
 0xa8d   :  { %v1196_v19 = vpop.eup %1195 }
 0xa8e   :  { %643 = vrot.lane.b32.xlu1 %v1196_v19, %s1381_s1 }
 0xa9a   :  { %v630_v21 = vpop.permute.xlu0 %629 }
 0xa9b   :  { %v1528_v22 = vadd.f32 %v630_v21, %v615_v20 }
 0xa9d   :  { %1197 = vtanh.f32 %v1528_v22 }
 0xaa3   :  { %v1198_v24 = vpop.eup %1197 }
 0xaa4   :  { %641 = vrot.lane.b32.xlu2 %v1198_v24, %s1381_s1 }
 0xafe   :  { %v642_v25 = vpop.permute.xlu2 %641 }
 0xaff   :  { %v1534_v28 = vmul.f32 %v642_v25, %v596_v9 }
 0xb00   :  { %v644_v26 = vpop.permute.xlu1 %643 }
 0xb01   :  { %v1532_v27 = vmul.f32 %v644_v26, %v611_v14 }
 0xb03   :  { %v661_v29 = vrot.slane %v1532_v27, 7 }
 0xb05   :  { %v662_v30 = vsel %vm189_vm10, %v661_v29, %v1534_v28 }
 0xb06   :  { %663 = vrot.lane.b32.xlu0 %v662_v30, %s1380_s0 }
 0xb78   :  { %v664_v23 = vpop.permute.xlu0 %663 }
 0xb79   :  { %1099 = vmatmul.msk.f32.vlgmr.msrb.gmra.mxu1 %vm63_vm1, %v664_v23  ;;  %v777_v23 = vld [vmem:[#allocation4 + $0x6] sm:$0x1] }
 0xbf6   :  { %v684_v35 = vpop.f32.mrf.mxu1 }
 0xbf7   :  { %v688_v36 = vrot.slane %v684_v35, 1  ;;  %v691_v37 = vadd.f32 %v684_v35, %v659_v33  ;;  %v778_v33 = vld [vmem:[#allocation4 + $0xe] sm:$0x1] }
 0xbf9   :  { %v692_v41 = vadd.f32 %v688_v36, %v660_v34  ;;  %1199 = vtanh.f32 %v691_v37  ;;  %v1100_v43 = vmul.f32 -1.442695, %v691_v37 }
 0xbfb   :  { %1201 = vtanh.f32 %v692_v41  ;;  %v1101_v50 = vmul.f32 -1.442695, %v692_v41 }
 0xbfc   :  { %1203 = vpow2.f32 %v1100_v43 }
 0xbff   :  { %v1200_v42 = vpop.eup %1199 }
 0xc00   :  { %737 = vrot.lane.b32.xlu2 %v1200_v42, %s1381_s1 }
 0xc01   :  { %v1202_v39 = vpop.eup %1201 }
 0xc02   :  { %739 = vrot.lane.b32.xlu1 %v1202_v39, %s1381_s1  ;;  %v1204_v44 = vpop.eup %1203 }
 0xc03   :  { %v699_v45 = vadd.f32 1.0, %v1204_v44 }
 0xc05   :  { %1205 = vrcp.f32 %v699_v45  ;;  %v712_v55 = vand.u32 2147483648, %v699_v45  ;;  %vm706_vm4 = vweird.f32 %v699_v45  ;;  %v710_v58 = vand.u32 2147483647, %v699_v45 }
 0xc06   :  { %1207 = vpow2.f32 %v1101_v50 }
 0xc07   :  { %v713_v61 = vor.u32 1.1754944e-38, %v712_v55  ;;  %vm711_vm6 = vcmp.eq.f32.partialorder %v710_v58, 8.507059e+37 }
 0xc0b   :  { %v1206_v46 = vpop.eup %1205 }
 0xc0c   :  { %v702_v49 = vmul.f32 %v1206_v46, %v699_v45  ;;  %v1208_v53 = vpop.eup %1207  ;;  %vm707_vm3 = vweird.f32 %v1206_v46 }
 0xc0d   :  { %v700_v56 = vadd.f32 1.0, %v1208_v53  ;;  %vm708_vm5 = vmor %vm706_vm4, %vm707_vm3 }
 0xc0e   :  { %v703_v51 = vsub.f32 1.0, %v702_v49 }
 0xc0f   :  { %1209 = vrcp.f32 %v700_v56  ;;  %v727_v6 = vand.u32 2147483648, %v700_v56  ;;  %vm721_vm8 = vweird.f32 %v700_v56  ;;  %v725_v7 = vand.u32 2147483647, %v700_v56 }
 0xc10   :  { %v704_v52 = vmul.f32 %v1206_v46, %v703_v51 }
 0xc11   :  { %v728_v9 = vor.u32 1.1754944e-38, %v727_v6  ;;  %vm726_vm11 = vcmp.eq.f32.partialorder %v725_v7, 8.507059e+37 }
 0xc12   :  { %v705_v54 = vadd.f32 %v1206_v46, %v704_v52 }
 0xc14   :  { %v709_v59 = vsel %vm708_vm5, %v1206_v46, %v705_v54 }
 0xc15   :  { %v714_v63 = vsel %vm711_vm6, %v713_v61, %v709_v59  ;;  %v1210_v1 = vpop.eup %1209 }
 0xc16   :  { %v717_v2 = vmul.f32 %v1210_v1, %v700_v56  ;;  %vm722_vm7 = vweird.f32 %v1210_v1  ;;  %v733_v13 = vmul.f32 %v714_v63, %v1528_v22 }
 0xc17   :  { %vm723_vm9 = vmor %vm721_vm8, %vm722_vm7 }
 0xc18   :  { %v718_v3 = vsub.f32 1.0, %v717_v2 }
 0xc1a   :  { %v719_v4 = vmul.f32 %v1210_v1, %v718_v3 }
 0xc1c   :  { %v720_v5 = vadd.f32 %v1210_v1, %v719_v4 }
 0xc1e   :  { %v724_v8 = vsel %vm723_vm9, %v1210_v1, %v720_v5 }
 0xc1f   :  { %v729_v11 = vsel %vm726_vm11, %v728_v9, %v724_v8 }
 0xc20   :  { %v734_v17 = vmul.f32 %v729_v11, %v1523_v18 }
 0xc5a   :  { %v738_v62 = vpop.permute.xlu2 %737 }
 0xc5b   :  { %v743_v0 = vmul.f32 %v738_v62, %v714_v63 }
 0xc5d   :  { %747 = vrot.lane.b32.xlu1 %v743_v0, %s1380_s0 }
 0xc74   :  { %v740_v10 = vpop.permute.xlu1 %739 }
 0xc75   :  { %v744_v12 = vmul.f32 %v740_v10, %v729_v11 }
 0xc77   :  { %749 = vrot.lane.b32.xlu0 %v744_v12, %s1380_s0 }
 0xccf   :  { %v748_v14 = vpop.permute.xlu1 %747 }
 0xcd0   :  { %v1546_v15 = vadd.f32 %v748_v14, %v733_v13 }
 0xcd2   :  { %1211 = vtanh.f32 %v1546_v15 }
 0xcd8   :  { %v1212_v16 = vpop.eup %1211 }
 0xcd9   :  { %759 = vrot.lane.b32.xlu0 %v1212_v16, %s1381_s1 }
 0xce9   :  { %v750_v19 = vpop.permute.xlu0 %749 }
 0xcea   :  { %v1551_v20 = vadd.f32 %v750_v19, %v734_v17 }
 0xcec   :  { %1213 = vtanh.f32 %v1551_v20 }
 0xcf2   :  { %v1214_v21 = vpop.eup %1213 }
 0xcf3   :  { %761 = vrot.lane.b32.xlu2 %v1214_v21, %s1381_s1 }
 0xd4b   :  { %v760_v24 = vpop.permute.xlu0 %759 }
 0xd4c   :  { %v1557_v26 = vmul.f32 %v760_v24, %v714_v63 }
 0xd4d   :  { %v762_v22 = vpop.permute.xlu2 %761 }
 0xd4e   :  { %v1555_v25 = vmul.f32 %v762_v22, %v729_v11 }
 0xd50   :  { %v779_v29 = vrot.slane %v1555_v25, 7 }
 0xd52   :  { %v780_v30 = vsel %vm189_vm10, %v779_v29, %v1557_v26 }
 0xd53   :  { %781 = vrot.lane.b32.xlu1 %v780_v30, %s1380_s0 }
 0xdc5   :  { %v782_v18 = vpop.permute.xlu1 %781 }
 0xdc6   :  { %1102 = vmatmul.msk.f32.vlgmr.msrb.gmra.mxu2 %vm63_vm1, %v782_v18 }
 0xe49   :  { %v802_v34 = vpop.f32.mrf.mxu2 }
 0xe4a   :  { %v806_v35 = vrot.slane %v802_v34, 1  ;;  %v809_v36 = vadd.f32 %v802_v34, %v777_v23  ;;  %v896_v34 = vld [vmem:[#allocation4 + $0xf] sm:$0x1] }
 0xe4c   :  { %v810_v37 = vadd.f32 %v806_v35, %v778_v33  ;;  %1215 = vtanh.f32 %v809_v36  ;;  %v1103_v45 = vmul.f32 -1.442695, %v809_v36  ;;  %v895_v33 = vld [vmem:[#allocation4 + $0x7] sm:$0x1] }
 0xe4e   :  { %1217 = vtanh.f32 %v810_v37  ;;  %v1104_v39 = vmul.f32 -1.442695, %v810_v37 }
 0xe50   :  { %1219 = vpow2.f32 %v1104_v39 }
 0xe52   :  { %v1216_v41 = vpop.eup %1215 }
 0xe53   :  { %855 = vrot.lane.b32.xlu0 %v1216_v41, %s1381_s1 }
 0xe54   :  { %v1218_v42 = vpop.eup %1217 }
 0xe55   :  { %857 = vrot.lane.b32.xlu2 %v1218_v42, %s1381_s1 }
 0xe56   :  { %v1220_v43 = vpop.eup %1219 }
 0xe57   :  { %v818_v44 = vadd.f32 1.0, %v1220_v43 }
 0xe59   :  { %1221 = vrcp.f32 %v818_v44  ;;  %v845_v55 = vand.u32 2147483648, %v818_v44  ;;  %vm839_vm13 = vweird.f32 %v818_v44  ;;  %v843_v56 = vand.u32 2147483647, %v818_v44 }
 0xe5a   :  { %1223 = vpow2.f32 %v1103_v45 }
 0xe5b   :  { %v846_v59 = vor.u32 1.1754944e-38, %v845_v55  ;;  %vm844_vm15 = vcmp.eq.f32.partialorder %v843_v56, 8.507059e+37 }
 0xe5f   :  { %v1222_v46 = vpop.eup %1221 }
 0xe60   :  { %v835_v49 = vmul.f32 %v1222_v46, %v818_v44  ;;  %v1224_v51 = vpop.eup %1223  ;;  %vm840_vm12 = vweird.f32 %v1222_v46 }
 0xe61   :  { %v817_v52 = vadd.f32 1.0, %v1224_v51  ;;  %vm841_vm14 = vmor %vm839_vm13, %vm840_vm12 }
 0xe62   :  { %v836_v50 = vsub.f32 1.0, %v835_v49 }
 0xe63   :  { %1225 = vrcp.f32 %v817_v52  ;;  %v830_v5 = vand.u32 2147483648, %v817_v52  ;;  %vm824_vm3 = vweird.f32 %v817_v52  ;;  %v828_v6 = vand.u32 2147483647, %v817_v52 }
 0xe64   :  { %v837_v53 = vmul.f32 %v1222_v46, %v836_v50 }
 0xe65   :  { %v831_v8 = vor.u32 1.1754944e-38, %v830_v5  ;;  %vm829_vm5 = vcmp.eq.f32.partialorder %v828_v6, 8.507059e+37 }
 0xe66   :  { %v838_v54 = vadd.f32 %v1222_v46, %v837_v53 }
 0xe68   :  { %v842_v58 = vsel %vm841_vm14, %v1222_v46, %v838_v54  ;;  %vm183_vm14 = vcmask 253952  }
 0xe69   :  { %v1226_v61 = vpop.eup %1225  ;;  %v847_v63 = vsel %vm844_vm15, %v846_v59, %v842_v58 }
 0xe6a   :  { %v820_v1 = vmul.f32 %v1226_v61, %v817_v52  ;;  %vm825_vm2 = vweird.f32 %v1226_v61  ;;  %v852_v16 = vmul.f32 %v847_v63, %v1551_v20 }
 0xe6b   :  { %vm826_vm4 = vmor %vm824_vm3, %vm825_vm2 }
 0xe6c   :  { %v821_v2 = vsub.f32 1.0, %v820_v1 }
 0xe6e   :  { %v822_v3 = vmul.f32 %v1226_v61, %v821_v2 }
 0xe70   :  { %v823_v4 = vadd.f32 %v1226_v61, %v822_v3 }
 0xe72   :  { %v827_v7 = vsel %vm826_vm4, %v1226_v61, %v823_v4 }
 0xe73   :  { %v832_v10 = vsel %vm829_vm5, %v831_v8, %v827_v7 }
 0xe74   :  { %v851_v12 = vmul.f32 %v832_v10, %v1546_v15 }
 0xeaf   :  { %v858_v62 = vpop.permute.xlu2 %857 }
 0xeb0   :  { %v862_v0 = vmul.f32 %v858_v62, %v847_v63 }
 0xeb2   :  { %867 = vrot.lane.b32.xlu1 %v862_v0, %s1380_s0 }
 0xec5   :  { %v856_v9 = vpop.permute.xlu0 %855 }
 0xec6   :  { %v861_v11 = vmul.f32 %v856_v9, %v832_v10 }
 0xec8   :  { %865 = vrot.lane.b32.xlu2 %v861_v11, %s1380_s0 }
 0xf22   :  { %v866_v13 = vpop.permute.xlu2 %865 }
 0xf23   :  { %v1569_v14 = vadd.f32 %v866_v13, %v851_v12 }
 0xf24   :  { %v868_v17 = vpop.permute.xlu1 %867 }
 0xf25   :  { %1227 = vtanh.f32 %v1569_v14  ;;  %v1573_v19 = vadd.f32 %v868_v17, %v852_v16 }
 0xf27   :  { %1229 = vtanh.f32 %v1573_v19 }
 0xf2b   :  { %v1228_v21 = vpop.eup %1227 }
 0xf2c   :  { %877 = vrot.lane.b32.xlu1 %v1228_v21, %s1381_s1 }
 0xf2d   :  { %v1230_v24 = vpop.eup %1229 }
 0xf2e   :  { %879 = vrot.lane.b32.xlu0 %v1230_v24, %s1381_s1 }
 0xf9e   :  { %v878_v22 = vpop.permute.xlu1 %877 }
 0xf9f   :  { %v1580_v30 = vmul.f32 %v878_v22, %v832_v10 }
 0xfa0   :  { %v880_v15 = vpop.permute.xlu0 %879 }
 0xfa1   :  { %v1578_v29 = vmul.f32 %v880_v15, %v847_v63 }
 0xfa3   :  { %v897_v20 = vrot.slane %v1578_v29, 7 }
 0xfa5   :  { %v898_v18 = vsel %vm189_vm10, %v897_v20, %v1580_v30 }
 0xfa6   :  { %899 = vrot.lane.b32.xlu2 %v898_v18, %s1380_s0 }
0x1000   :  { %v900_v23 = vpop.permute.xlu2 %899 }
0x1001   :  { %1105 = vmatmul.msk.f32.vlgmr.msrb.gmra.mxu3 %vm63_vm1, %v900_v23 }
0x1084   :  { %v920_v35 = vpop.f32.mrf.mxu3 }
0x1085   :  { %v924_v36 = vrot.slane %v920_v35, 1  ;;  %v927_v37 = vadd.f32 %v920_v35, %v895_v33 }
0x1087   :  { %v928_v41 = vadd.f32 %v924_v36, %v896_v34  ;;  %1231 = vtanh.f32 %v927_v37  ;;  %v1106_v43 = vmul.f32 -1.442695, %v927_v37 }
0x1089   :  { %1233 = vtanh.f32 %v928_v41  ;;  %v1107_v44 = vmul.f32 -1.442695, %v928_v41 }
0x108a   :  { %1235 = vpow2.f32 %v1106_v43 }
0x108b   :  { %1237 = vpow2.f32 %v1107_v44 }
0x108d   :  { %v1232_v42 = vpop.eup %1231 }
0x108e   :  { %973 = vrot.lane.b32.xlu1 %v1232_v42, %s1381_s1 }
0x108f   :  { %v1234_v39 = vpop.eup %1233 }
0x1090   :  { %975 = vrot.lane.b32.xlu0 %v1234_v39, %s1381_s1  ;;  %v1236_v45 = vpop.eup %1235 }
0x1091   :  { %v1238_v46 = vpop.eup %1237  ;;  %v935_v49 = vadd.f32 1.0, %v1236_v45 }
0x1092   :  { %v936_v50 = vadd.f32 1.0, %v1238_v46 }
0x1093   :  { %1239 = vrcp.f32 %v935_v49  ;;  %v948_v62 = vand.u32 2147483648, %v935_v49  ;;  %vm942_vm6 = vweird.f32 %v935_v49  ;;  %v946_v63 = vand.u32 2147483647, %v935_v49 }
0x1094   :  { %1241 = vrcp.f32 %v936_v50  ;;  %v963_v2 = vand.u32 2147483648, %v936_v50  ;;  %vm957_vm9 = vweird.f32 %v936_v50  ;;  %v961_v4 = vand.u32 2147483647, %v936_v50 }
0x1095   :  { %v949_v3 = vor.u32 1.1754944e-38, %v948_v62  ;;  %vm947_vm11 = vcmp.eq.f32.partialorder %v946_v63, 8.507059e+37 }
0x1096   :  { %v964_v9 = vor.u32 1.1754944e-38, %v963_v2  ;;  %vm962_vm13 = vcmp.eq.f32.partialorder %v961_v4, 8.507059e+37 }
0x1099   :  { %v1240_v51 = vpop.eup %1239 }
0x109a   :  { %v1242_v52 = vpop.eup %1241  ;;  %v938_v53 = vmul.f32 %v1240_v51, %v935_v49  ;;  %vm943_vm1 = vweird.f32 %v1240_v51 }
0x109b   :  { %v953_v54 = vmul.f32 %v1242_v52, %v936_v50  ;;  %vm944_vm7 = vmor %vm942_vm6, %vm943_vm1  ;;  %vm958_vm8 = vweird.f32 %v1242_v52 }
0x109c   :  { %v939_v55 = vsub.f32 1.0, %v938_v53  ;;  %vm959_vm12 = vmor %vm957_vm9, %vm958_vm8 }
0x109d   :  { %v954_v56 = vsub.f32 1.0, %v953_v54 }
0x109e   :  { %v940_v58 = vmul.f32 %v1240_v51, %v939_v55 }
0x109f   :  { %v955_v59 = vmul.f32 %v1242_v52, %v954_v56 }
0x10a0   :  { %v941_v61 = vadd.f32 %v1240_v51, %v940_v58 }
0x10a1   :  { %v956_v0 = vadd.f32 %v1242_v52, %v955_v59 }
0x10a2   :  { %v945_v1 = vsel %vm944_vm7, %v1240_v51, %v941_v61 }
0x10a3   :  { %v950_v6 = vsel %vm947_vm11, %v949_v3, %v945_v1  ;;  %v960_v7 = vsel %vm959_vm12, %v1242_v52, %v956_v0 }
0x10a4   :  { %v965_v11 = vsel %vm962_vm13, %v964_v9, %v960_v7 }
0x10a5   :  { %v970_v13 = vmul.f32 %v965_v11, %v1573_v19 }
0x1100   :  { %v974_v5 = vpop.permute.xlu1 %973 }
0x1101   :  { %v979_v8 = vmul.f32 %v974_v5, %v950_v6 }
0x1102   :  { %v976_v10 = vpop.permute.xlu0 %975 }
0x1103   :  { %983 = vrot.lane.b32.xlu0 %v979_v8, %s1380_s0  ;;  %v980_v12 = vmul.f32 %v976_v10, %v965_v11 }
0x1105   :  { %985 = vrot.lane.b32.xlu2 %v980_v12, %s1380_s0 }
0x110b   :  { %177 = vrot.lane.b32.xlu0 %v1443_v60, %s1380_s0  ;;  %v969_v60 = vmul.f32 %v950_v6, %v1569_v14 }
0x1113   :  { %299 = vrot.lane.b32.xlu0 %v1463_v47, %s1380_s0 }
0x111b   :  { %417 = vrot.lane.b32.xlu0 %v1486_v38, %s1380_s0 }
0x1123   :  { %651 = vrot.lane.b32.xlu0 %v1534_v28, %s1380_s0 }
0x112b   :  { %771 = vrot.lane.b32.xlu0 %v1555_v25, %s1380_s0 }
0x115f   :  { %v986_v16 = vpop.permute.xlu2 %985 }
0x1160   :  { %v990_v17 = vadd.f32 %v986_v16, %v970_v13 }
0x1162   :  { %1243 = vtanh.f32 %v990_v17  ;;  %v1022_v38 = vrot.slane %v990_v17, 7 }
0x1168   :  { %v1244_v21 = vpop.eup %1243 }
0x1169   :  { %997 = vrot.lane.b32.xlu1 %v1244_v21, %s1381_s1 }
0x1171   :  { %179 = vrot.lane.b32.xlu1 %v1440_v57, %s1380_s0 }
0x1175   :  { %v984_v47 = vpop.permute.xlu0 %983 }
0x1176   :  { %v989_v24 = vadd.f32 %v984_v47, %v969_v60 }
0x1178   :  { %1245 = vtanh.f32 %v989_v24  ;;  %v1023_v28 = vsel %vm189_vm10, %v1022_v38, %v989_v24 }
0x1179   :  { %415 = vrot.lane.b32.xlu1 %v1488_v40, %s1380_s0 }
0x117d   :  { %v178_v25 = vpop.permute.xlu0 %177 }
0x117e   :  { %v1246_v19 = vpop.eup %1245  ;;  %184 = vst.msk [vmem:[#allocation9] sm:$0x1] %vm183_vm14, %v178_v25 }
0x117f   :  { %995 = vrot.lane.b32.xlu2 %v1246_v19, %s1381_s1 }
0x1181   :  { %533 = vrot.lane.b32.xlu1 %v1511_v32, %s1380_s0 }
0x1185   :  { %v300_v57 = vpop.permute.xlu0 %299 }
0x1186   :  { %304 = vst.msk [vmem:[#allocation9 + $0x9] sm:$0x1] %vm183_vm14, %v300_v57 }
0x1187   :  { %297 = vrot.lane.b32.xlu2 %v1465_v48, %s1380_s0 }
0x1189   :  { %653 = vrot.lane.b32.xlu1 %v1532_v27, %s1380_s0 }
0x118d   :  { %v418_v40 = vpop.permute.xlu0 %417 }
0x118e   :  { %422 = vst.msk [vmem:[#allocation9 + $0xa] sm:$0x1] %vm183_vm14, %v418_v40 }
0x118f   :  { %535 = vrot.lane.b32.xlu2 %v1509_v31, %s1380_s0 }
0x1191   :  { %887 = vrot.lane.b32.xlu1 %v1580_v30, %s1380_s0 }
0x1195   :  { %v652_v14 = vpop.permute.xlu0 %651 }
0x1196   :  { %657 = vst.msk [vmem:[#allocation9 + $0x4] sm:$0x1] %vm183_vm14, %v652_v14 }
0x1197   :  { %769 = vrot.lane.b32.xlu2 %v1557_v26, %s1380_s0 }
0x119d   :  { %v772_v32 = vpop.permute.xlu0 %771 }
0x119e   :  { %776 = vst.msk [vmem:[#allocation9 + $0xd] sm:$0x1] %vm183_vm14, %v772_v32 }
0x119f   :  { %889 = vrot.lane.b32.xlu2 %v1578_v29, %s1380_s0 }
0x11d9   :  { %v996_v48 = vpop.permute.xlu2 %995 }
0x11da   :  { %v1001_v27 = vmul.f32 %v996_v48, %v950_v6 }
0x11db   :  { %v998_v22 = vpop.permute.xlu1 %997 }
0x11dc   :  { %1005 = vrot.lane.b32.xlu0 %v1001_v27, %s1380_s0  ;;  %v1002_v31 = vmul.f32 %v998_v22, %v965_v11 }
0x11de   :  { %v1013_v15 = vrot.slane %v1002_v31, 7  ;;  %1007 = vrot.lane.b32.xlu1 %v1002_v31, %s1380_s0 }
0x11e0   :  { %v1014_v20 = vsel %vm189_vm10, %v1013_v15, %v1001_v27 }
0x11e1   :  { %v298_v30 = vpop.permute.xlu2 %297  ;;  %1015 = vrot.lane.b32.xlu2 %v1014_v20, %s1380_s0 }
0x11e2   :  { %303 = vst.msk [vmem:[#allocation9 + $0x1] sm:$0x1] %vm183_vm14, %v298_v30 }
0x11e3   :  { %v180_v26 = vpop.permute.xlu1 %179 }
0x11e4   :  { %185 = vst.msk [vmem:[#allocation9 + $0x8] sm:$0x1] %vm183_vm14, %v180_v26 }
0x11e9   :  { %v536_v29 = vpop.permute.xlu2 %535  ;;  %1024 = vrot.lane.b32.xlu2 %v1023_v28, %s1382_s27 }
0x11ea   :  { %540 = vst.msk [vmem:[#allocation9 + $0xb] sm:$0x1] %vm183_vm14, %v536_v29 }
0x11eb   :  { %v416_v18 = vpop.permute.xlu1 %415 }
0x11ec   :  { %421 = vst.msk [vmem:[#allocation9 + $0x2] sm:$0x1] %vm183_vm14, %v416_v18 }
0x11f1   :  { %v770_v23 = vpop.permute.xlu2 %769 }
0x11f2   :  { %775 = vst.msk [vmem:[#allocation9 + $0x5] sm:$0x1] %vm183_vm14, %v770_v23 }
0x11f3   :  { %v534_v33 = vpop.permute.xlu1 %533 }
0x11f4   :  { %539 = vst.msk [vmem:[#allocation9 + $0x3] sm:$0x1] %vm183_vm14, %v534_v33 }
0x11f9   :  { %v890_v34 = vpop.permute.xlu2 %889 }
0x11fa   :  { %894 = vst.msk [vmem:[#allocation9 + $0xe] sm:$0x1] %vm183_vm14, %v890_v34 }
0x11fb   :  { %v654_v35 = vpop.permute.xlu1 %653 }
0x11fc   :  { %658 = vst.msk [vmem:[#allocation9 + $0xc] sm:$0x1] %vm183_vm14, %v654_v35 }
0x1203   :  { %v888_v36 = vpop.permute.xlu1 %887 }
0x1204   :  { %893 = vst.msk [vmem:[#allocation9 + $0x6] sm:$0x1] %vm183_vm14, %v888_v36 }
0x123b   :  { %v1016_v37 = vpop.permute.xlu2 %1015 }
0x123c   :  { %1019 = vst.msk [vmem:[#allocation2] sm:$0x3] %vm52_vm0, %v1016_v37 }
0x123d   :  { %1031 = vst.msk [vmem:[#allocation10] sm:$0x3] %vm52_vm0, %v1016_v37 }
0x123e   :  { %1056 = dma.vmem_to_hbm [thread:$0]  %s1052_s29, 32, %s1054_s6, [#allocation11]  }
0x1243   :  { %v1025_v41 = vpop.permute.xlu2 %1024 }
0x1244   :  { %1027 = vst.msk [vmem:[#allocation3] sm:$0x3] %vm52_vm0, %v1025_v41 }
0x1245   :  { %1032 = vst.msk [vmem:[#allocation12] sm:$0x3] %vm52_vm0, %v1025_v41 }
0x1246   :  { %1067 = dma.vmem_to_hbm [thread:$0]  %s1063_s8, 32, %s1065_s11, [#allocation11]  }
0x124e   :  { %v1006_v42 = vpop.permute.xlu0 %1005 }
0x124f   :  { %1011 = vst.msk [vmem:[#allocation9 + $0x7] sm:$0x1] %vm183_vm14, %v1006_v42 }
0x1250   :  { %v1008_v39 = vpop.permute.xlu1 %1007 }
0x1251   :  { %1012 = vst.msk [vmem:[#allocation9 + $0xf] sm:$0x1] %vm183_vm14, %v1008_v39 }
0x1252   :  { %1045 = dma.vmem_to_hbm [thread:$0]  %s1038_s12, 256, %s1040_s15, [#allocation6], %s1376_s23, %s1376_s23, %s1377_s24  }
0x1253   :  { %1371 = dma.done.wait [#allocation6], 256  }
0x1254   :  { %1372 = vsyncadd [#allocation6], 4294967040 }
0x1255   :  { %1373 = dma.done.wait [#allocation11], 64  }
0x1256   :  { %1374 = vsyncadd [#allocation11], 4294967232 }
0x1257   :  { %1080 = vsyncpa [#allocation5], 1 }
0x1258   :  { %1081 = vsyncpa [#allocation8], 1 }
0x1259   :  { %1082 = vsyncpa [#allocation6], 1 }
0x125a   :  { %1083 = vsyncpa [#allocation11], 1 }

</bundles_post_ra>
